<compile_context>
chip_gen: v7x
topology: tpu7x:2x2x1
jax: 0.10.0
libtpu: 0.0.40
codegen_flags: <defaults>
</compile_context>

<pallas_src>
import math

import jax
import jax.numpy as jnp
import numpy as np
from jax.experimental import pallas as pl
from jax.experimental.pallas import tpu as pltpu

LANE = 128
SUBLANE = 8


def _round_up(x, m):
    return ((x + m - 1) // m) * m


def _choose_b_tile(batch):
    """MXU-filling batch tile; keep >=2 grid steps when batch allows (v7x megacore)."""
    if batch <= 2 * SUBLANE:
        return SUBLANE
    half = _round_up((batch + 1) // 2, SUBLANE)
    return min(256, half)


# ---------------------------------------------------------------------------
# Fused Pallas kernel:
#   shared im2col -> ONE packed conv matmul -> validity mask -> time max ->
#   bias + ReLU -> FC matmul + bias
# ---------------------------------------------------------------------------
def _make_fused_kernel(filter_sizes, num_filters, seq_len, ks_max, l_out, f_pad):

    def kernel(x_ref, w_ref, b_ref, fcw_ref, fcb_ref, o_ref):
        x = x_ref[...]                                   # (Bt, L + ks_max-ks_min, E) bf16

        # Shared im2col for ALL branches: ks_max taps stacked along the lane axis.
        cols = jnp.concatenate(
            [x[:, t:t + l_out, :] for t in range(ks_max)], axis=-1
        )                                                # (Bt, l_out, ks_max*E)

        # One packed matmul for the 3 conv branches (bf16 in, f32 accumulate).
        acc = jax.lax.dot_general(
            cols, w_ref[...],
            dimension_numbers=(((2,), (0,)), ((), ())),
            preferred_element_type=jnp.float32)          # (Bt, l_out, f_pad) f32

        # Static per-branch validity mask: a branch with window ks only has
        # seq_len - ks + 1 valid rows; kill trailing rows that read the zero
        # time-pad with -inf before the time max.
        neg_inf = jnp.float32(-jnp.inf)
        t_idx = jax.lax.broadcasted_iota(jnp.int32, (l_out, f_pad), 0)
        c_idx = jax.lax.broadcasted_iota(jnp.int32, (l_out, f_pad), 1)
        last_valid = jnp.full((l_out, f_pad), l_out - 1, jnp.int32)
        col = 0
        for ks, nf in zip(filter_sizes, num_filters):
            in_branch = (c_idx >= col) & (c_idx < col + nf)
            last_valid = jnp.where(in_branch, seq_len - ks, last_valid)
            col += nf
        mask_add = jnp.where(t_idx <= last_valid, 0.0, neg_inf)   # (l_out, f_pad) f32
        acc = acc + mask_add[None, :, :]

        # Max-pool over time FIRST, then bias + ReLU (exact: bias is
        # time-invariant and ReLU is monotone).  Epilogue stays f32.
        p = jnp.max(acc, axis=1)                         # (Bt, f_pad) f32
        p = jnp.maximum(p + b_ref[...], 0.0)

        logits = jnp.dot(p.astype(jnp.bfloat16), fcw_ref[...],
                         preferred_element_type=jnp.float32) + fcb_ref[...]
        o_ref[...] = logits                              # (Bt, c_pad) f32

    return kernel


def textcnn_forward(x_embed, conv_w, conv_b, fc_w, fc_b, *,
                    filter_sizes, num_filters, seq_len, b_tile):
    """x_embed: (B_pad, seq_len + ks_max - ks_min, E) bf16, B_pad % b_tile == 0.
    Returns (B_pad, C_pad) f32."""
    B, L_in, E = x_embed.shape
    assert B % b_tile == 0
    f_pad = conv_w.shape[1]
    c_pad = fc_w.shape[1]
    ks_max = max(filter_sizes)
    ks_min = min(filter_sizes)
    l_out = seq_len - ks_min + 1
    assert L_in == seq_len + (ks_max - ks_min)

    kernel = _make_fused_kernel(tuple(filter_sizes), tuple(num_filters),
                                seq_len, ks_max, l_out, f_pad)

    in_specs = [
        pl.BlockSpec((b_tile, L_in, E), lambda i: (i, 0, 0)),   # activations
        pl.BlockSpec(conv_w.shape, lambda i: (0, 0)),           # packed conv weight
        pl.BlockSpec(conv_b.shape, lambda i: (0, 0)),           # packed conv bias
        pl.BlockSpec(fc_w.shape, lambda i: (0, 0)),             # packed FC weight
        pl.BlockSpec(fc_b.shape, lambda i: (0, 0)),             # FC bias
    ]
    out_specs = pl.BlockSpec((b_tile, c_pad), lambda i: (i, 0))

    # Advisory cost estimate (helps XLA overlap the embedding gather HLO).
    flops = 2 * B * l_out * (ks_max * E) * f_pad + 2 * B * f_pad * c_pad
    bytes_accessed = (x_embed.size * 2 + conv_w.size * 2 + conv_b.size * 4
                      + fc_w.size * 2 + fc_b.size * 4 + B * c_pad * 4)

    return pl.pallas_call(
        kernel,
        out_shape=jax.ShapeDtypeStruct((B, c_pad), jnp.float32),
        grid_spec=pltpu.PrefetchScalarGridSpec(
            num_scalar_prefetch=0,
            grid=(B // b_tile,),
            in_specs=in_specs,
            out_specs=out_specs,
        ),
        compiler_params=pltpu.CompilerParams(
            dimension_semantics=("parallel",),   # megacore sharding on v7x
        ),
        cost_estimate=pl.CostEstimate(
            flops=int(flops), transcendentals=0,
            bytes_accessed=int(bytes_accessed)),
    )(x_embed, conv_w, conv_b, fc_w, fc_b)


# ---------------------------------------------------------------------------
# Model (parameters + forward)
# ---------------------------------------------------------------------------
class CNN_NLP_Pallas:
    def __init__(self, key, vocab_size, embed_dim=32,
                 filter_sizes=(3, 4, 5), num_filters=(8, 8, 8),
                 num_classes=2, dropout=0.5):
        self.embed_dim = embed_dim
        self.filter_sizes = tuple(filter_sizes)
        self.num_filters = tuple(num_filters)
        self.num_classes = num_classes
        self.dropout = dropout            # identity at inference (eval mode)
        max_norm = 5.0                    # nn.Embedding(..., max_norm=5.0)

        keys = jax.random.split(key, 2 + 2 * len(filter_sizes) + 2)

        # Embedding: N(0,1), padding_idx=0 row zeroed.  max_norm renormalization
        # hoisted here (constant at inference), with an eps guard on the zero row.
        emb = jax.random.normal(keys[0], (vocab_size, embed_dim), jnp.float32)
        emb = emb.at[0].set(0.0)
        norms = jnp.sqrt(jnp.sum(emb * emb, axis=-1, keepdims=True))
        scale = jnp.where(norms > max_norm, max_norm / jnp.maximum(norms, 1e-7), 1.0)
        self.emb_table = (emb * scale).astype(jnp.bfloat16)

        # Packed conv params: one (ks_max*E, F_PAD) weight with every branch's
        # real filters at its tap-row offsets, one (1, F_PAD) bias.
        # F_PAD = 128 fits all generations; pad to 256 on v6e/v7x only if
        # num_filters is ever scaled up past 128.
        ks_max = max(self.filter_sizes)
        sum_nf = int(np.sum(self.num_filters))
        f_pad = _round_up(sum_nf, LANE)
        packed_w = jnp.zeros((ks_max * embed_dim, f_pad), jnp.float32)
        packed_b = jnp.zeros((1, f_pad), jnp.float32)
        col = 0
        for i, (fs, nf) in enumerate(zip(self.filter_sizes, self.num_filters)):
            bound = 1.0 / math.sqrt(embed_dim * fs)
            w = jax.random.uniform(keys[1 + 2 * i], (nf, embed_dim, fs),
                                   jnp.float32, -bound, bound)
            b = jax.random.uniform(keys[2 + 2 * i], (nf,),
                                   jnp.float32, -bound, bound)
            # PyTorch weight (F, E, k) -> im2col layout rows = tap*E + e.
            w_im2col = jnp.transpose(w, (2, 1, 0)).reshape(fs * embed_dim, nf)
            packed_w = packed_w.at[:fs * embed_dim, col:col + nf].set(w_im2col)
            packed_b = packed_b.at[0, col:col + nf].set(b)
            col += nf
        self.conv_w = packed_w.astype(jnp.bfloat16)
        self.conv_b = packed_b            # f32 epilogue
        self.f_pad = f_pad

        # Linear: PyTorch weight (C, sum_F) -> padded (F_PAD, C_PAD); rows for
        # padded conv channels are zero so they contribute nothing.
        c_pad = _round_up(num_classes, LANE)
        bound = 1.0 / math.sqrt(sum_nf)
        fw = jax.random.uniform(keys[-2], (num_classes, sum_nf),
                                jnp.float32, -bound, bound)
        fb = jax.random.uniform(keys[-1], (num_classes,),
                                jnp.float32, -bound, bound)
        fw_pad = jnp.zeros((f_pad, c_pad), jnp.float32)
        fw_pad = fw_pad.at[:sum_nf, :num_classes].set(fw.T)
        self.fc_w = fw_pad.astype(jnp.bfloat16)
        self.fc_b = jnp.zeros((1, c_pad), jnp.float32).at[0, :num_classes].set(fb)
        self.c_pad = c_pad

    def __call__(self, input_ids):
        B, L = input_ids.shape
        assert L >= max(self.filter_sizes), \
            "seq_len must be >= max(filter_sizes) for Conv1d to produce output"

        b_tile = _choose_b_tile(B)
        b_pad = _round_up(B, b_tile)
        t_pad = max(self.filter_sizes) - min(self.filter_sizes)

        # Pad ids (id 0 maps to the zero embedding row) BEFORE the gather:
        # batch -> b_pad, time -> L + (ks_max - ks_min) for the shared im2col.
        ids = jnp.pad(input_ids.astype(jnp.int32), ((0, b_pad - B), (0, t_pad)))
        x_embed = self.emb_table[ids]                    # (b_pad, L + t_pad, E) bf16

        logits_pad = textcnn_forward(
            x_embed, self.conv_w, self.conv_b, self.fc_w, self.fc_b,
            filter_sizes=self.filter_sizes, num_filters=self.num_filters,
            seq_len=L, b_tile=b_tile)                    # (b_pad, C_pad) f32

        # TODO(synk): nn.Dropout(p=0.5) is identity at inference (eval mode).
        return logits_pad[:B, :self.num_classes]


# ---------------------------------------------------------------------------
# Pure-JAX reference (mirrors the PyTorch forward) for correctness checking
# ---------------------------------------------------------------------------
def _reference_forward(model, input_ids):
    emb = model.emb_table.astype(jnp.float32)
    x = emb[input_ids.astype(jnp.int32)]                 # (B, L, E)
    w = model.conv_w.astype(jnp.float32)
    b = model.conv_b[0]
    E = model.embed_dim
    pooled, col = [], 0
    for ks, nf in zip(model.filter_sizes, model.num_filters):
        wj = w[:ks * E, col:col + nf]                    # (ks*E, nf)
        l_out = x.shape[1] - ks + 1
        cols = jnp.concatenate([x[:, t:t + l_out, :] for t in range(ks)], axis=-1)
        conv = jnp.einsum("blk,kf->blf", cols, wj,
                          precision=jax.lax.Precision.HIGHEST) + b[col:col + nf]
        pooled.append(jnp.max(jax.nn.relu(conv), axis=1))
        col += nf
    feat = jnp.concatenate(pooled, axis=-1)              # (B, sum_nf)
    fw = model.fc_w.astype(jnp.float32)[:col, :model.num_classes]
    fb = model.fc_b[0, :model.num_classes]
    return feat @ fw + fb


if __name__ == "__main__":
    key = jax.random.PRNGKey(0)
    k_param, k_ids = jax.random.split(key)

    vocab_size = 32
    batch, seq_len = 2, 16

    model = CNN_NLP_Pallas(
        k_param, vocab_size=vocab_size, embed_dim=32,
        filter_sizes=(3, 4, 5), num_filters=(8, 8, 8), num_classes=2,
    )

    input_ids = jax.random.randint(k_ids, (batch, seq_len), 0, vocab_size,
                                   dtype=jnp.int32)

    logits = jax.block_until_ready(model(input_ids))
    assert logits.shape == (batch, 2) and logits.dtype == jnp.float32

    ref = jax.block_until_ready(_reference_forward(model, input_ids))
    err = float(jnp.max(jnp.abs(logits - ref)))
    assert err < 5e-2, f"kernel vs reference mismatch: {err}"

    # Larger batch exercises the multi-step (grid > 1) / big-tile path.
    ids2 = jax.random.randint(jax.random.PRNGKey(1), (40, seq_len), 0, vocab_size,
                              dtype=jnp.int32)
    logits2 = jax.block_until_ready(model(ids2))
    ref2 = jax.block_until_ready(_reference_forward(model, ids2))
    err2 = float(jnp.max(jnp.abs(logits2 - ref2)))
    assert logits2.shape == (40, 2) and err2 < 5e-2, f"batch-40 mismatch: {err2}"

    print("KERNEL_OK")
</pallas_src>

<mosaic_0001>
module attributes {stable_mosaic.version = 11 : i64} {
  func.func @kernel(%arg0: i32, %arg1: memref<8x18x32xbf16, #tpu.memory_space<vmem>>, %arg2: memref<160x128xbf16, #tpu.memory_space<vmem>>, %arg3: memref<1x128xf32, #tpu.memory_space<vmem>>, %arg4: memref<128x128xbf16, #tpu.memory_space<vmem>>, %arg5: memref<1x128xf32, #tpu.memory_space<vmem>>, %arg6: memref<8x128xf32, #tpu.memory_space<vmem>>) attributes {dimension_semantics = [#tpu.dimension_semantics<parallel>], iteration_bounds = array<i64: 1>, scalar_prefetch = 0 : i64, scratch_operands = 0 : i64, tpu.core_type = #tpu.core_type<tc>, window_params = [{transform_indices = @transform_0, window_bounds = array<i64: 8, 18, 32>}, {pipeline_mode = #tpu.pipeline_mode<synchronous>, transform_indices = @transform_1, window_bounds = array<i64: 160, 128>}, {pipeline_mode = #tpu.pipeline_mode<synchronous>, transform_indices = @transform_2, window_bounds = array<i64: 1, 128>}, {pipeline_mode = #tpu.pipeline_mode<synchronous>, transform_indices = @transform_3, window_bounds = array<i64: 128, 128>}, {pipeline_mode = #tpu.pipeline_mode<synchronous>, transform_indices = @transform_4, window_bounds = array<i64: 1, 128>}, {transform_indices = @transform_5, window_bounds = array<i64: 8, 128>}]} {
    %c0 = arith.constant 0 : index
    %c0_0 = arith.constant 0 : index
    %c0_1 = arith.constant 0 : index
    %0 = vector.load %arg1[%c0, %c0_0, %c0_1] : memref<8x18x32xbf16, #tpu.memory_space<vmem>>, vector<8x18x32xbf16>
    %1 = vector.extract_strided_slice %0 {offsets = [0, 0, 0], sizes = [8, 14, 32], strides = [1, 1, 1]} : vector<8x18x32xbf16> to vector<8x14x32xbf16>
    %2 = vector.extract_strided_slice %0 {offsets = [0, 1, 0], sizes = [8, 14, 32], strides = [1, 1, 1]} : vector<8x18x32xbf16> to vector<8x14x32xbf16>
    %3 = vector.extract_strided_slice %0 {offsets = [0, 2, 0], sizes = [8, 14, 32], strides = [1, 1, 1]} : vector<8x18x32xbf16> to vector<8x14x32xbf16>
    %4 = vector.extract_strided_slice %0 {offsets = [0, 3, 0], sizes = [8, 14, 32], strides = [1, 1, 1]} : vector<8x18x32xbf16> to vector<8x14x32xbf16>
    %5 = vector.extract_strided_slice %0 {offsets = [0, 4, 0], sizes = [8, 14, 32], strides = [1, 1, 1]} : vector<8x18x32xbf16> to vector<8x14x32xbf16>
    %6 = tpu.concatenate %1, %2, %3, %4, %5 in 2 : vector<8x14x32xbf16>, vector<8x14x32xbf16>, vector<8x14x32xbf16>, vector<8x14x32xbf16>, vector<8x14x32xbf16> -> vector<8x14x160xbf16>
    %c0_2 = arith.constant 0 : index
    %c0_3 = arith.constant 0 : index
    %7 = vector.load %arg2[%c0_2, %c0_3] : memref<160x128xbf16, #tpu.memory_space<vmem>>, vector<160x128xbf16>
    %cst = arith.constant dense<0.000000e+00> : vector<8x14x128xf32>
    %8 = tpu.matmul %6, %7, %cst {dimension_numbers = #tpu.dot_dimension_numbers<[2], [0], [0, 1], [1], [0, 0, 0, 1, 1, 1], [], []>} : vector<8x14x160xbf16>, vector<160x128xbf16>, vector<8x14x128xf32> -> vector<8x14x128xf32>
    %9 = tpu.iota {dimensions = array<i32: 0>} : vector<14x128xi32>
    %10 = tpu.iota {dimensions = array<i32: 1>} : vector<14x128xi32>
    %c13_i32 = arith.constant 13 : i32
    %11 = vector.broadcast %c13_i32 : i32 to vector<14x128xi32>
    %c0_i32 = arith.constant 0 : i32
    %12 = vector.broadcast %c0_i32 : i32 to vector<14x128xi32>
    %13 = arith.cmpi sge, %10, %12 : vector<14x128xi32>
    %c8_i32 = arith.constant 8 : i32
    %14 = vector.broadcast %c8_i32 : i32 to vector<14x128xi32>
    %15 = arith.cmpi slt, %10, %14 : vector<14x128xi32>
    %16 = arith.andi %13, %15 : vector<14x128xi1>
    %c13_i32_4 = arith.constant 13 : i32
    %17 = vector.broadcast %c13_i32_4 : i32 to vector<14x128xi32>
    %18 = arith.select %16, %17, %11 : vector<14x128xi1>, vector<14x128xi32>
    %c8_i32_5 = arith.constant 8 : i32
    %19 = vector.broadcast %c8_i32_5 : i32 to vector<14x128xi32>
    %20 = arith.cmpi sge, %10, %19 : vector<14x128xi32>
    %c16_i32 = arith.constant 16 : i32
    %21 = vector.broadcast %c16_i32 : i32 to vector<14x128xi32>
    %22 = arith.cmpi slt, %10, %21 : vector<14x128xi32>
    %23 = arith.andi %20, %22 : vector<14x128xi1>
    %c12_i32 = arith.constant 12 : i32
    %24 = vector.broadcast %c12_i32 : i32 to vector<14x128xi32>
    %25 = arith.select %23, %24, %18 : vector<14x128xi1>, vector<14x128xi32>
    %c16_i32_6 = arith.constant 16 : i32
    %26 = vector.broadcast %c16_i32_6 : i32 to vector<14x128xi32>
    %27 = arith.cmpi sge, %10, %26 : vector<14x128xi32>
    %c24_i32 = arith.constant 24 : i32
    %28 = vector.broadcast %c24_i32 : i32 to vector<14x128xi32>
    %29 = arith.cmpi slt, %10, %28 : vector<14x128xi32>
    %30 = arith.andi %27, %29 : vector<14x128xi1>
    %c11_i32 = arith.constant 11 : i32
    %31 = vector.broadcast %c11_i32 : i32 to vector<14x128xi32>
    %32 = arith.select %30, %31, %25 : vector<14x128xi1>, vector<14x128xi32>
    %33 = arith.cmpi sle, %9, %32 : vector<14x128xi32>
    %cst_7 = arith.constant 0.000000e+00 : f32
    %cst_8 = arith.constant 0xFF800000 : f32
    %34 = vector.broadcast %cst_7 : f32 to vector<14x128xf32>
    %35 = vector.broadcast %cst_8 : f32 to vector<14x128xf32>
    %36 = arith.select %33, %34, %35 : vector<14x128xi1>, vector<14x128xf32>
    %37 = vector.shape_cast %36 : vector<14x128xf32> to vector<1x14x128xf32>
    %38 = vector.broadcast %37 : vector<1x14x128xf32> to vector<8x14x128xf32>
    %39 = arith.addf %8, %38 : vector<8x14x128xf32>
    %cst_9 = arith.constant dense<0xFF800000> : vector<8x128xf32>
    %40 = vector.multi_reduction <maximumf>, %39, %cst_9 [1] : vector<8x14x128xf32> to vector<8x128xf32>
    %c0_10 = arith.constant 0 : index
    %c0_11 = arith.constant 0 : index
    %41 = vector.load %arg3[%c0_10, %c0_11] : memref<1x128xf32, #tpu.memory_space<vmem>>, vector<1x128xf32>
    %42 = vector.broadcast %41 : vector<1x128xf32> to vector<8x128xf32>
    %43 = arith.addf %40, %42 : vector<8x128xf32>
    %cst_12 = arith.constant 0.000000e+00 : f32
    %44 = vector.broadcast %cst_12 : f32 to vector<8x128xf32>
    %45 = arith.maximumf %43, %44 : vector<8x128xf32>
    %46 = arith.truncf %45 : vector<8x128xf32> to vector<8x128xbf16>
    %c0_13 = arith.constant 0 : index
    %c0_14 = arith.constant 0 : index
    %47 = vector.load %arg4[%c0_13, %c0_14] : memref<128x128xbf16, #tpu.memory_space<vmem>>, vector<128x128xbf16>
    %cst_15 = arith.constant dense<0.000000e+00> : vector<8x128xf32>
    %48 = tpu.matmul %46, %47, %cst_15 {dimension_numbers = #tpu.dot_dimension_numbers<[1], [0], [0], [1], [0, 0, 1, 1], [], []>} : vector<8x128xbf16>, vector<128x128xbf16>, vector<8x128xf32> -> vector<8x128xf32>
    %c0_16 = arith.constant 0 : index
    %c0_17 = arith.constant 0 : index
    %49 = vector.load %arg5[%c0_16, %c0_17] : memref<1x128xf32, #tpu.memory_space<vmem>>, vector<1x128xf32>
    %50 = vector.broadcast %49 : vector<1x128xf32> to vector<8x128xf32>
    %51 = arith.addf %48, %50 : vector<8x128xf32>
    %c0_18 = arith.constant 0 : index
    %c0_19 = arith.constant 0 : index
    %52 = vector.load %arg6[%c0_18, %c0_19] : memref<8x128xf32, #tpu.memory_space<vmem>>, vector<8x128xf32>
    tpu.vector_store %arg6[%c0_18, %c0_19], %51 {strides = array<i32>} : memref<8x128xf32, #tpu.memory_space<vmem>>, vector<8x128xf32>,
    return
  }
  func.func @transform_0(%arg0: i32) -> (i32, i32, i32) {
    %c0_i32 = arith.constant 0 : i32
    %c0_i32_0 = arith.constant 0 : i32
    %c0_i32_1 = arith.constant 0 : i32
    return %arg0, %c0_i32, %c0_i32_0 : i32, i32, i32
  }
  func.func @transform_1(%arg0: i32) -> (i32, i32) {
    %c0_i32 = arith.constant 0 : i32
    %c0_i32_0 = arith.constant 0 : i32
    %c0_i32_1 = arith.constant 0 : i32
    return %c0_i32, %c0_i32_0 : i32, i32
  }
  func.func @transform_2(%arg0: i32) -> (i32, i32) {
    %c0_i32 = arith.constant 0 : i32
    %c0_i32_0 = arith.constant 0 : i32
    %c0_i32_1 = arith.constant 0 : i32
    return %c0_i32, %c0_i32_0 : i32, i32
  }
  func.func @transform_3(%arg0: i32) -> (i32, i32) {
    %c0_i32 = arith.constant 0 : i32
    %c0_i32_0 = arith.constant 0 : i32
    %c0_i32_1 = arith.constant 0 : i32
    return %c0_i32, %c0_i32_0 : i32, i32
  }
  func.func @transform_4(%arg0: i32) -> (i32, i32) {
    %c0_i32 = arith.constant 0 : i32
    %c0_i32_0 = arith.constant 0 : i32
    %c0_i32_1 = arith.constant 0 : i32
    return %c0_i32, %c0_i32_0 : i32, i32
  }
  func.func @transform_5(%arg0: i32) -> (i32, i32) {
    %c0_i32 = arith.constant 0 : i32
    %c0_i32_0 = arith.constant 0 : i32
    return %arg0, %c0_i32 : i32, i32
  }
}

</mosaic_0001>

<bundles_post_ra>
// kernel: tpu_custom_call.1
= control target key start
LH: loop header
LB: loop body
LE: loop exit
PB: predicated region body
PF: predicated region fallthrough
CT: control target
= control target key end

     0   :  { %s2482_s24 = smov 64   ;;  %vm206_vm0 = vsmask.f32 6400  ;;  %s2483_s29 = smov 32   ;;  %v2485_v61 = vmov 0   ;;  %s3152_s0 = inlined_call_operand.vmem [shape: bf16[8,18,32], index: 0, kind: input, shape index: {}]   ;;  %s3153_s1 = inlined_call_operand.vmem [shape: bf16[160,128], index: 1, kind: input, shape index: {}]   ;;  %s3154_s2 = inlined_call_operand.vmem [shape: f32[1,128], index: 2, kind: input, shape index: {}]   ;;  %s3155_s3 = inlined_call_operand.vmem [shape: bf16[128,128], index: 3, kind: input, shape index: {}]   ;;  %s3156_s4 = inlined_call_operand.vmem [shape: f32[1,128], index: 4, kind: input, shape index: {}]   ;;  %s3157_s5 = inlined_call_operand.hbm [shape: f32[8,128], index: 5, kind: output, shape index: {}]  }
   0x1   :  { %v2526_v0 = vld [vmem:[%s3152_s0] sm:$0xff]   ;;  %v2531_v1 = vld [vmem:[%s3152_s0 + $0xc] sm:$0xff]   ;;  %v2541_v7 = vld [vmem:[%s3152_s0 + $0x8] ss:$0 sps:$4 sm:$0x11]   ;;  %s2484_s13 = smov 96   ;;  %1455 = vmatprep.subr.bf16.mxu0 %v2485_v61 }
   0x2   :  { %v158_v2 = vrot.slane %v2526_v0, 1  ;;  %v87_v3 = vshrl.u32 %v2526_v0, 16  ;;  %v89_v4 = vshll.u32 %v2526_v0, 16  ;;  %v94_v5 = vshrl.u32 %v2531_v1, 16  ;;  %v2547_v11 = vld [vmem:[%s3152_s0 + $0x18] sm:$0xff]   ;;  %v2571_v33 = vld [vmem:[%s3152_s0 + $0x24] sm:$0xff]  }
   0x3   :  { %v96_v6 = vshll.u32 %v2531_v1, 16  ;;  %v211_v15 = vshll.u32 %v2541_v7, 16  ;;  %v2553_v18 = vld [vmem:[%s3152_s0 + $0x14] ss:$0 sps:$4 sm:$0x11]   ;;  %v101_v19 = vshrl.u32 %v2547_v11, 16 }
   0x4   :  { %166 = vrot.lane.b32.xlu0 %v158_v2, %s2482_s24  ;;  %v91_v8 = vrot.slane %v89_v4, 1  ;;  %v207_v9 = vrot.slane %v87_v3, 1  ;;  %v208_v10 = vrot.slane %v89_v4, 2  ;;  %v215_v13 = vrot.slane %v94_v5, 1  ;;  %v2582_v36 = vld [vmem:[%s3152_s0 + $0x30] sm:$0xff]   ;;  %v2605_v54 = vld [vmem:[%s3152_s0 + $0x3c] sm:$0xff]  }
   0x5   :  { %v98_v12 = vrot.slane %v96_v6, 1  ;;  %v216_v14 = vrot.slane %v96_v6, 2  ;;  %v213_v21 = vrot.slane %v211_v15, 2  ;;  %v103_v22 = vshll.u32 %v2547_v11, 16  ;;  %v2612_v60 = vld [vmem:[%s3152_s0 + $0x48] sm:$0xff]   ;;  %v2440_v2 = vld [vmem:[%s3153_s1] sm:$0xff]  }
   0x6   :  { %v92_v16 = vor.u32 %v91_v8, %v87_v3  ;;  %v209_v17 = vor.u32 %v208_v10, %v207_v9  ;;  %v159_v23 = vrot.slane %v2531_v1, 1  ;;  %v219_v24 = vshll.u32 %v2553_v18, 16  ;;  %v2563_v26 = vld [vmem:[%s3152_s0 + $0x20] ss:$0 sps:$4 sm:$0x11]   ;;  %1456 = vmatpush1.bf16.msra.mxu0 %v2440_v2  ;;  %v2441_v10 = vld [vmem:[%s3153_s1 + $0x8] sm:$0xff]  }
   0x7   :  { %v99_v20 = vor.u32 %v98_v12, %v94_v5  ;;  %v223_v25 = vrot.slane %v101_v19, 1  ;;  %v105_v27 = vrot.slane %v103_v22, 1  ;;  %v224_v28 = vrot.slane %v103_v22, 2  ;;  %v2577_v35 = vld [vmem:[%s3152_s0 + $0x2c] ss:$0 sps:$4 sm:$0x11]   ;;  %1457 = vmatprep.subr.bf16.mxu0 %v2485_v61 }
   0x8   :  { %142 = vrot.lane.b32.xlu0 %v92_v16, %s2483_s29  ;;  %v214_v29 = vsel %vm206_vm0, %v209_v17, %v213_v21  ;;  %v217_v30 = vor.u32 %v216_v14, %v215_v13  ;;  %v221_v31 = vrot.slane %v219_v24, 2  ;;  %v227_v32 = vshll.u32 %v2563_v26, 16  ;;  %v2598_v48 = vld [vmem:[%s3152_s0 + $0x38] ss:$0 sps:$4 sm:$0x11]   ;;  %v2442_v22 = vld [vmem:[%s3153_s1 + $0x10] sm:$0xff]  }
   0x9   :  { %144 = vrot.lane.b32.xlu1 %v99_v20, %s2483_s29  ;;  %v106_v34 = vor.u32 %v105_v27, %v101_v19  ;;  %v225_v37 = vor.u32 %v224_v28, %v223_v25  ;;  %v110_v39 = vshll.u32 %v2571_v33, 16  ;;  %v108_v41 = vshrl.u32 %v2571_v33, 16  ;;  %v2624_v5 = vld [vmem:[%s3152_s0 + $0x44] ss:$0 sps:$4 sm:$0x11]   ;;  %v2642_v13 = vld [vmem:[%s3152_s0 + $0x54] sm:$0xff]  }
   0xa   :  { %v229_v38 = vrot.slane %v227_v32, 2  ;;  %v222_v40 = vsel %vm206_vm0, %v217_v30, %v221_v31  ;;  %v115_v42 = vshrl.u32 %v2582_v36, 16  ;;  %v117_v43 = vshll.u32 %v2582_v36, 16  ;;  %v2631_v9 = vld [vmem:[%s3152_s0 + $0x50] ss:$0 sps:$4 sm:$0x11]   ;;  %1458 = vmatpush1.bf16.msra.mxu0 %v2441_v10 }
   0xb   :  { %v160_v44 = vrot.slane %v2547_v11, 1  ;;  %v112_v46 = vrot.slane %v110_v39, 1  ;;  %v235_v47 = vshll.u32 %v2577_v35, 16  ;;  %v231_v49 = vrot.slane %v108_v41, 1  ;;  %1459 = vmatprep.subr.bf16.mxu0 %v2485_v61 }
   0xc   :  { %168 = vrot.lane.b32.xlu0 %v159_v23, %s2482_s24  ;;  %v230_v45 = vsel %vm206_vm0, %v225_v37, %v229_v38  ;;  %v232_v50 = vrot.slane %v110_v39, 2  ;;  %v161_v51 = vrot.slane %v2571_v33, 1  ;;  %v119_v52 = vrot.slane %v117_v43, 1 }
   0xd   :  { %271 = vrot.lane.b32.xlu1 %v214_v29, %s2484_s13  ;;  %v239_v53 = vrot.slane %v115_v42, 1  ;;  %v113_v55 = vor.u32 %v112_v46, %v108_v41  ;;  %v240_v56 = vrot.slane %v117_v43, 2  ;;  %v243_v57 = vshll.u32 %v2598_v48, 16  ;;  %v2444_v43 = vld [vmem:[%s3153_s1 + $0x20] sm:$0xff]  }
   0xe   :  { %v233_v58 = vor.u32 %v232_v50, %v231_v49  ;;  %v237_v59 = vrot.slane %v235_v47, 2  ;;  %v120_v62 = vor.u32 %v119_v52, %v115_v42  ;;  %v124_v63 = vshll.u32 %v2605_v54, 16  ;;  %1460 = vmatpush1.bf16.msra.mxu0 %v2442_v22  ;;  %v2668_v42 = vld [vmem:[%s3152_s0 + $0x5c] ss:$0 sps:$4 sm:$0x11]  }
   0xf   :  { %v241_v3 = vor.u32 %v240_v56, %v239_v53  ;;  %v245_v4 = vrot.slane %v243_v57, 2  ;;  %v122_v8 = vshrl.u32 %v2605_v54, 16  ;;  %v131_v12 = vshll.u32 %v2612_v60, 16  ;;  %1461 = vmatprep.subr.bf16.mxu0 %v2485_v61 }
  0x10   :  { %146 = vrot.lane.b32.xlu0 %v106_v34, %s2483_s29  ;;  %v238_v6 = vsel %vm206_vm0, %v233_v58, %v237_v59  ;;  %v162_v14 = vrot.slane %v2582_v36, 1  ;;  %v126_v16 = vrot.slane %v124_v63, 1  ;;  %v129_v17 = vshrl.u32 %v2612_v60, 16  ;;  %v2443_v34 = vld [vmem:[%s3153_s1 + $0x18] sm:$0xff]  }
  0x11   :  { %273 = vrot.lane.b32.xlu1 %v222_v40, %s2484_s13  ;;  %v246_v15 = vsel %vm206_vm0, %v241_v3, %v245_v4  ;;  %v247_v19 = vrot.slane %v122_v8, 1  ;;  %v248_v20 = vrot.slane %v124_v63, 2  ;;  %v251_v21 = vshll.u32 %v2624_v5, 16 }
  0x12   :  { %v163_v23 = vrot.slane %v2605_v54, 1  ;;  %v133_v24 = vrot.slane %v131_v12, 1  ;;  %v259_v25 = vshll.u32 %v2631_v9, 16  ;;  %v138_v27 = vshll.u32 %v2642_v13, 16  ;;  %1462 = vmatpush1.bf16.msra.mxu0 %v2443_v34 }
  0x13   :  { %v127_v28 = vor.u32 %v126_v16, %v122_v8  ;;  %v255_v29 = vrot.slane %v129_v17, 1  ;;  %v256_v30 = vrot.slane %v131_v12, 2  ;;  %v249_v31 = vor.u32 %v248_v20, %v247_v19  ;;  %1463 = vmatprep.subr.bf16.mxu0 %v2485_v61 }
  0x14   :  { %275 = vrot.lane.b32.xlu0 %v230_v45, %s2484_s13  ;;  %v253_v32 = vrot.slane %v251_v21, 2  ;;  %v164_v37 = vrot.slane %v2612_v60, 1  ;;  %v134_v38 = vor.u32 %v133_v24, %v129_v17  ;;  %v261_v39 = vrot.slane %v259_v25, 2 }
  0x15   :  { %170 = vrot.lane.b32.xlu1 %v160_v44, %s2482_s24  ;;  %v136_v40 = vshrl.u32 %v2642_v13, 16  ;;  %v140_v41 = vrot.slane %v138_v27, 1  ;;  %v257_v44 = vor.u32 %v256_v30, %v255_v29  ;;  %v264_v49 = vrot.slane %v138_v27, 2 }
  0x16   :  { %v254_v45 = vsel %vm206_vm0, %v249_v31, %v253_v32  ;;  %v267_v50 = vshll.u32 %v2668_v42, 16  ;;  %1464 = vmatpush1.bf16.msra.mxu0 %v2444_v43 }
  0x17   :  { %v262_v46 = vsel %vm206_vm0, %v257_v44, %v261_v39  ;;  %v263_v47 = vrot.slane %v136_v40, 1 }
  0x18   :  { %172 = vrot.lane.b32.xlu0 %v161_v51, %s2482_s24  ;;  %v2445_v51 = vld [vmem:[%s3153_s1 + $0x28] sm:$0xff]  }
  0x19   :  { %148 = vrot.lane.b32.xlu1 %v113_v55, %s2483_s29 }
  0x1c   :  { %150 = vrot.lane.b32.xlu0 %v120_v62, %s2483_s29 }
  0x1d   :  { %277 = vrot.lane.b32.xlu1 %v238_v6, %s2484_s13 }
  0x20   :  { %279 = vrot.lane.b32.xlu0 %v246_v15, %s2484_s13 }
  0x21   :  { %174 = vrot.lane.b32.xlu1 %v162_v14, %s2482_s24 }
  0x24   :  { %176 = vrot.lane.b32.xlu0 %v163_v23, %s2482_s24 }
  0x25   :  { %152 = vrot.lane.b32.xlu1 %v127_v28, %s2483_s29 }
  0x28   :  { %154 = vrot.lane.b32.xlu0 %v134_v38, %s2483_s29 }
  0x29   :  { %281 = vrot.lane.b32.xlu1 %v254_v45, %s2484_s13 }
  0x2a   :  { %10 = vsyncpa [#allocation3], 0  ;;  %1465 = vmatprep.subr.bf16.mxu0 %v2485_v61  ;;  %v165_v52 = vrot.slane %v2642_v13, 1  ;;  %v141_v53 = vor.u32 %v140_v41, %v136_v40  ;;  %v265_v55 = vor.u32 %v264_v49, %v263_v47  ;;  %v269_v56 = vrot.slane %v267_v50, 2  ;;  %v2446_v57 = vld [vmem:[%s3153_s1 + $0x30] sm:$0xff]   ;;  %v2447_v59 = vld [vmem:[%s3153_s1 + $0x38] sm:$0xff]  }
  0x2b   :  { %1466 = vmatpush1.bf16.msra.mxu0 %v2445_v51  ;;  %v2448_v62 = vld [vmem:[%s3153_s1 + $0x40] sm:$0xff]   ;;  %v2449_v63 = vld [vmem:[%s3153_s1 + $0x48] sm:$0xff]   ;;  %v383_v3 = vlaneseq  ;;  %v2486_v4 = vmov 1966171168   ;;  %vm312_vm1 = vcmask 261120   ;;  %vm287_vm2 = vcmask 1045504  }
  0x2c   :  { %283 = vrot.lane.b32.xlu0 %v262_v46, %s2484_s13  ;;  %1467 = vmatprep.subr.bf16.mxu0 %v2485_v61  ;;  %v270_v58 = vsel %vm206_vm0, %v265_v55, %v269_v56  ;;  %v411_v6 = vunpack.c.l.s4 %v2486_v4  ;;  %v288_v10 = vrot.slane %v2526_v0, 2  ;;  %v289_v12 = vrot.slane %v2541_v7, 2  ;;  %s2492_s16 = smov [#allocation2]  }
  0x2d   :  { %178 = vrot.lane.b32.xlu1 %v164_v37, %s2482_s24  ;;  %v2710_v15 = vshrl.u32 %v383_v3, 7  ;;  %v291_v17 = vrot.slane %v2531_v1, 2  ;;  %vm329_vm3 = vcmask 523264   ;;  %vm346_vm4 = vcmask 785408   ;;  %s2329_s17 = sshll.u32 %s2492_s16, 4  ;;  %s2330_s17 = int_to_ptr.vmem [resolvable:$true] %s2329_s17 }
  0x2e   :  { %v412_v16 = vunpack.c.0.s8 %v411_v6  ;;  %v290_v20 = vsel %vm287_vm2, %v288_v10, %v289_v12  ;;  %v294_v22 = vrot.slane %v2547_v11, 2  ;;  %v295_v7 = vrot.slane %v2563_v26, 2  ;;  %s2458_s18 = scalar_lea.vmem %s2330_s17, 128  ;;  %p2463_p1 = scmp.lt.s32.totalorder %s2330_s17, %s2330_s17 }
  0x2f   :  { %1468 = vmatpush1.bf16.msra.mxu0 %v2446_v57  ;;  %v297_v27 = vrot.slane %v2571_v33, 2  ;;  %v298_v28 = vrot.slane %v2577_v35, 2  ;;  %v300_v29 = vrot.slane %v2582_v36, 2  ;;  %v301_v30 = vrot.slane %v2598_v48, 2  ;;  %p2459_p0 = scmp.ne.s32.totalorder %s2330_s17, %s2458_s18  ;;  %p2464_p2 = scmp.lt.s32.totalorder %s2458_s18, %s2458_s18 }
  0x30   :  { %180 = vrot.lane.b32.xlu0 %v165_v52, %s2482_s24  ;;  %1469 = vmatprep.subr.bf16.mxu0 %v2485_v61  ;;  %v2720_v23 = vsub.s32 %v412_v16, %v2710_v15  ;;  %v303_v32 = vrot.slane %v2605_v54, 2  ;;  %v304_v34 = vrot.slane %v2624_v5, 2  ;;  %v306_v39 = vrot.slane %v2612_v60, 2 }
  0x31   :  { %156 = vrot.lane.b32.xlu1 %v141_v53, %s2483_s29  ;;  %v307_v40 = vrot.slane %v2631_v9, 2  ;;  %v309_v35 = vrot.slane %v2642_v13, 2  ;;  %v310_v45 = vrot.slane %v2668_v42, 2  ;;  %v2743_v46 = vsel %vm287_vm2, %v297_v27, %v298_v28  ;;  %p2465_p3 = por %p2464_p2, %p2463_p1 }
  0x32   :  { %v2746_v9 = vsel %vm287_vm2, %v300_v29, %v301_v30  ;;  %v2752_v55 = vsel %vm287_vm2, %v303_v32, %v304_v34  ;;  %vm2488_vm5 = vmmov 0   ;;  %vm2212_vm14 = vcmask 1041409  }
  0x33   :  { %1470 = vmatpush1.bf16.msra.mxu0 %v2447_v59  ;;  %v2755_v56 = vsel %vm287_vm2, %v306_v39, %v307_v40  ;;  %vm2215_vm15 = vcmask 1042434   ;;  %vm2218_vm0 = vcmask 1043459   ;;  %p2466_p4 = pnand %p2465_p3, %p2459_p0 }
  0x34   :  { %1471 = vmatprep.subr.bf16.mxu0 %v2485_v61 }
  0x35   :  { %285 = vrot.lane.b32.xlu1 %v270_v58, %s2484_s13 }
  0x37   :  { %1472 = vmatpush1.bf16.msra.mxu0 %v2448_v62 }
  0x38   :  { %1473 = vmatprep.subr.bf16.mxu0 %v2485_v61  ;;  %v292_v61 = vrot.slane %v2553_v18, 2 }
  0x3a   :  { %v293_v18 = vsel %vm287_vm2, %v291_v17, %v292_v61 }
  0x3b   :  { %1474 = vmatpush1.bf16.msra.mxu0 %v2449_v63  ;;  %v2761_v63 = vsel %vm287_vm2, %v309_v35, %v310_v45 }
  0x76   :  { %v167_v2 = vpop.permute.xlu0 %166 }
  0x7a   :  { %v143_v8 = vpop.permute.xlu0 %142 }
  0x7b   :  { %v145_v14 = vpop.permute.xlu1 %144  ;;  %v314_v19 = vsel %vm312_vm1, %v2526_v0, %v143_v8 }
  0x7c   :  { %v331_v25 = vsel %vm329_vm3, %v314_v19, %v167_v2  ;;  %v316_v37 = vsel %vm312_vm1, %v2531_v1, %v145_v14  ;;  %v296_v1 = vsel %vm287_vm2, %v294_v22, %v295_v7 }
  0x7e   :  { %v169_v21 = vpop.permute.xlu0 %168 }
  0x7f   :  { %v272_v24 = vpop.permute.xlu1 %271  ;;  %v333_v43 = vsel %vm329_vm3, %v316_v37, %v169_v21 }
  0x80   :  { %v348_v0 = vsel %vm346_vm4, %v331_v25, %v272_v24 }
  0x81   :  { %v408_v31 = vcombine.low %v348_v0, %v290_v20  ;;  %v409_v26 = vcombine.high %v348_v0, %v290_v20 }
  0x82   :  { %v147_v38 = vpop.permute.xlu0 %146 }
  0x83   :  { %v416_v41 = vrot.slane %v408_v31, %v2720_v23  ;;  %v423_v48 = vrot.slane %v409_v26, %v2720_v23  ;;  %v274_v44 = vpop.permute.xlu1 %273  ;;  %v318_v51 = vsel %vm312_vm1, %v2547_v11, %v147_v38 }
  0x84   :  { %v350_v5 = vsel %vm346_vm4, %v333_v43, %v274_v44 }
  0x85   :  { %v424_v47 = vcombine.high %v416_v41, %v416_v41  ;;  %v425_v49 = vcombine.high %v423_v48, %v423_v48  ;;  %v439_v50 = vrot.slane %v423_v48, %v2720_v23  ;;  %v457_v52 = vcombine.low %v350_v5, %v293_v18 }
  0x86   :  { %v458_v53 = vcombine.high %v350_v5, %v293_v18  ;;  %v276_v42 = vpop.permute.xlu0 %275  ;;  %v432_v57 = vrot.slane %v416_v41, %v2720_v23 }
  0x87   :  { %v446_v58 = vrot.slane %v424_v47, %v2720_v23  ;;  %v453_v59 = vrot.slane %v425_v49, %v2720_v23  ;;  %v171_v62 = vpop.permute.xlu1 %170  ;;  %v455_v11 = vcombine.high %v439_v50, %v439_v50  ;;  %v465_v2 = vrot.slane %v457_v52, %v2720_v23 }
  0x88   :  { %v472_v4 = vrot.slane %v458_v53, %v2720_v23  ;;  %v335_v6 = vsel %vm329_vm3, %v318_v51, %v171_v62 }
  0x89   :  { %v835_v8 = vcombine.low %v432_v57, %v446_v58  ;;  %v2353_v10 = vcombine.high %v432_v57, %v446_v58  ;;  %v837_v12 = vcombine.low %v439_v50, %v453_v59  ;;  %v352_v14 = vsel %vm346_vm4, %v335_v6, %v276_v42 }
  0x8a   :  { %v473_v16 = vcombine.high %v465_v2, %v465_v2  ;;  %v474_v17 = vcombine.high %v472_v4, %v472_v4  ;;  %v481_v61 = vrot.slane %v465_v2, %v2720_v23  ;;  %v488_v19 = vrot.slane %v472_v4, %v2720_v23  ;;  %v173_v20 = vpop.permute.xlu0 %172 }
  0x8b   :  { %v506_v21 = vcombine.low %v352_v14, %v296_v1  ;;  %v507_v22 = vcombine.high %v352_v14, %v296_v1  ;;  %v149_v7 = vpop.permute.xlu1 %148  ;;  %v2770_v24 = vrot.slane %v835_v8, %v2720_v23  ;;  %v2773_v25 = vrot.slane %v2353_v10, %v2720_v23 }
  0x8c   :  { %v495_v18 = vrot.slane %v473_v16, %v2720_v23  ;;  %v502_v27 = vrot.slane %v474_v17, %v2720_v23  ;;  %v503_v0 = vcombine.high %v481_v61, %v481_v61  ;;  %v504_v28 = vcombine.high %v488_v19, %v488_v19 }
  0x8d   :  { %v838_v29 = vcombine.low %v455_v11, %v481_v61  ;;  %v514_v30 = vrot.slane %v506_v21, %v2720_v23  ;;  %v521_v31 = vrot.slane %v507_v22, %v2720_v23  ;;  %v320_v26 = vsel %vm312_vm1, %v2571_v33, %v149_v7 }
  0x8e   :  { %v505_v32 = vcombine.high %v495_v18, %v495_v18  ;;  %v901_v34 = vcombine.low %v495_v18, %v503_v0  ;;  %v903_v37 = vcombine.low %v502_v27, %v504_v28  ;;  %v337_v38 = vsel %vm329_vm3, %v320_v26, %v173_v20  ;;  %v151_v39 = vpop.permute.xlu0 %150 }
  0x8f   :  { %v522_v40 = vcombine.high %v514_v30, %v514_v30  ;;  %v523_v35 = vcombine.high %v521_v31, %v521_v31  ;;  %v530_v41 = vrot.slane %v514_v30, %v2720_v23  ;;  %v537_v48 = vrot.slane %v521_v31, %v2720_v23  ;;  %v278_v43 = vpop.permute.xlu1 %277 }
  0x90   :  { %v902_v44 = vcombine.low %v505_v32, %v488_v19  ;;  %v2785_v45 = vrot.slane %v901_v34, %v2720_v23  ;;  %v2788_v5 = vrot.slane %v903_v37, %v2720_v23  ;;  %v354_v33 = vsel %vm346_vm4, %v337_v38, %v278_v43 }
  0x91   :  { %v544_v1 = vrot.slane %v522_v40, %v2720_v23  ;;  %v551_v47 = vrot.slane %v523_v35, %v2720_v23  ;;  %v553_v49 = vcombine.high %v537_v48, %v537_v48  ;;  %v555_v50 = vcombine.low %v354_v33, %v2743_v46 }
  0x92   :  { %v2795_v51 = vrot.slane %v902_v44, %v2720_v23  ;;  %v556_v52 = vcombine.high %v354_v33, %v2743_v46  ;;  %v322_v53 = vsel %vm312_vm1, %v2582_v36, %v151_v39  ;;  %v280_v42 = vpop.permute.xlu0 %279  ;;  %v859_v57 = vrot.slane %v837_v12, %v2720_v23 }
  0x93   :  { %v904_v58 = vcombine.low %v530_v41, %v544_v1  ;;  %v2354_v59 = vcombine.high %v530_v41, %v544_v1  ;;  %v968_v62 = vcombine.low %v537_v48, %v551_v47  ;;  %v563_v11 = vrot.slane %v555_v50, %v2720_v23  ;;  %v175_v2 = vpop.permute.xlu1 %174 }
  0x94   :  { %v570_v4 = vrot.slane %v556_v52, %v2720_v23  ;;  %v339_v6 = vsel %vm329_vm3, %v322_v53, %v175_v2  ;;  %v866_v8 = vrot.slane %v838_v29, %v2720_v23  ;;  %v868_v46 = vcombine.high %v2770_v24, %v2773_v25 }
  0x95   :  { %v2808_v36 = vrot.slane %v904_v58, %v2720_v23  ;;  %v2811_v10 = vrot.slane %v2354_v59, %v2720_v23  ;;  %v2814_v12 = vrot.slane %v968_v62, %v2720_v23  ;;  %v571_v14 = vcombine.high %v563_v11, %v563_v11 }
  0x96   :  { %v572_v16 = vcombine.high %v570_v4, %v570_v4  ;;  %v579_v17 = vrot.slane %v563_v11, %v2720_v23  ;;  %v586_v61 = vrot.slane %v570_v4, %v2720_v23  ;;  %v356_v19 = vsel %vm346_vm4, %v339_v6, %v280_v42  ;;  %v177_v20 = vpop.permute.xlu0 %176 }
  0x97   :  { %v593_v21 = vrot.slane %v571_v14, %v2720_v23  ;;  %v604_v22 = vcombine.low %v356_v19, %v2746_v9  ;;  %v605_v7 = vcombine.high %v356_v19, %v2746_v9  ;;  %v870_v18 = vcombine.high %v859_v57, %v866_v8  ;;  %v153_v27 = vpop.permute.xlu1 %152 }
  0x98   :  { %v600_v0 = vrot.slane %v572_v16, %v2720_v23  ;;  %v601_v28 = vcombine.high %v579_v17, %v579_v17  ;;  %v602_v29 = vcombine.high %v586_v61, %v586_v61  ;;  %v969_v30 = vcombine.low %v553_v49, %v579_v17 }
  0x99   :  { %v603_v31 = vcombine.high %v593_v21, %v593_v21  ;;  %v612_v26 = vrot.slane %v604_v22, %v2720_v23  ;;  %v619_v32 = vrot.slane %v605_v7, %v2720_v23  ;;  %v884_v34 = vrot.slane %v868_v46, %v2720_v23 }
  0x9a   :  { %v970_v37 = vcombine.low %v593_v21, %v601_v28  ;;  %v2827_v38 = vrot.slane %v969_v30, %v2720_v23  ;;  %v1034_v39 = vcombine.low %v600_v0, %v602_v29  ;;  %v898_v9 = vrot.slane %v870_v18, %v2720_v23  ;;  %v155_v49 = vpop.permute.xlu0 %154 }
  0x9b   :  { %v1033_v40 = vcombine.low %v603_v31, %v586_v61  ;;  %v620_v35 = vcombine.high %v612_v26, %v612_v26  ;;  %v621_v41 = vcombine.high %v619_v32, %v619_v32  ;;  %v628_v48 = vrot.slane %v612_v26, %v2720_v23  ;;  %v282_v43 = vpop.permute.xlu1 %281 }
  0x9c   :  { %v2832_v44 = vrot.slane %v970_v37, %v2720_v23  ;;  %v2835_v33 = vrot.slane %v1034_v39, %v2720_v23  ;;  %v635_v1 = vrot.slane %v619_v32, %v2720_v23  ;;  %v900_v47 = vcombine.low %v884_v34, %v898_v9 }
  0x9d   :  { %v2839_v50 = vrot.slane %v1033_v40, %v2720_v23  ;;  %v642_v52 = vrot.slane %v620_v35, %v2720_v23  ;;  %v649_v53 = vrot.slane %v621_v41, %v2720_v23  ;;  %v867_v42 = vcombine.low %v2770_v24, %v2773_v25 }
  0x9e   :  { %v651_v58 = vcombine.high %v635_v1, %v635_v1  ;;  %2367 = vmatprep.mubr.msk.bf16.mxu0 %vm312_vm1, %v900_v47  ;;  %v869_v59 = vcombine.low %v859_v57, %v866_v8  ;;  %v324_v62 = vsel %vm312_vm1, %v2605_v54, %v153_v27  ;;  %v934_v11 = vcombine.high %v2785_v45, %v2795_v51  ;;  %v284_v7 = vpop.permute.xlu0 %283 }
  0x9f   :  { %v1035_v2 = vcombine.low %v628_v48, %v642_v52  ;;  %v2355_v4 = vcombine.high %v628_v48, %v642_v52  ;;  %v1099_v6 = vcombine.low %v635_v1, %v649_v53  ;;  %v877_v46 = vrot.slane %v867_v42, %v2720_v23  ;;  %v179_v14 = vpop.permute.xlu1 %178 }
  0xa0   :  { %v891_v16 = vrot.slane %v869_v59, %v2720_v23  ;;  %v341_v24 = vsel %vm329_vm3, %v324_v62, %v177_v20  ;;  %v936_v25 = vcombine.high %v2788_v5, %v2808_v36  ;;  %v950_v57 = vrot.slane %v934_v11, %v2720_v23 }
  0xa1   :  { %v2857_v54 = vrot.slane %v1035_v2, %v2720_v23  ;;  %v2860_v8 = vrot.slane %v2355_v4, %v2720_v23  ;;  %v2863_v17 = vrot.slane %v1099_v6, %v2720_v23  ;;  %v358_v61 = vsel %vm346_vm4, %v341_v24, %v282_v43 }
  0xa2   :  { %v899_v19 = vcombine.low %v877_v46, %v891_v16  ;;  %v653_v21 = vcombine.low %v358_v61, %v2752_v55  ;;  %v654_v20 = vcombine.high %v358_v61, %v2752_v55  ;;  %v964_v22 = vrot.slane %v936_v25, %v2720_v23  ;;  %v181_v6 = vpop.permute.xlu0 %180 }
  0xa3   :  { %v326_v18 = vsel %vm312_vm1, %v2612_v60, %v155_v49  ;;  %v933_v27 = vcombine.low %v2785_v45, %v2795_v51  ;;  %v935_v0 = vcombine.low %v2788_v5, %v2808_v36  ;;  %v1000_v28 = vcombine.high %v2811_v10, %v2814_v12  ;;  %v157_v26 = vpop.permute.xlu1 %156 }
  0xa4   :  { %1488 = vmatmul.mubr.bf16.vlgmr.msra.gmra.mrb[0].mxu0 %v899_v19  ;;  %v661_v29 = vrot.slane %v653_v21, %v2720_v23  ;;  %v668_v55 = vrot.slane %v654_v20, %v2720_v23  ;;  %v966_v30 = vcombine.low %v950_v57, %v964_v22  ;;  %v343_v31 = vsel %vm329_vm3, %v326_v18, %v179_v14 }
  0xa5   :  { %v943_v60 = vrot.slane %v933_v27, %v2720_v23  ;;  %v957_v32 = vrot.slane %v935_v0, %v2720_v23  ;;  %v360_v45 = vsel %vm346_vm4, %v343_v31, %v284_v7  ;;  %v328_v5 = vsel %vm312_vm1, %v2642_v13, %v157_v26 }
  0xa6   :  { %v669_v51 = vcombine.high %v661_v29, %v661_v29  ;;  %v670_v36 = vcombine.high %v668_v55, %v668_v55  ;;  %v677_v34 = vrot.slane %v661_v29, %v2720_v23  ;;  %v684_v37 = vrot.slane %v668_v55, %v2720_v23  ;;  %2368 = vmatprep.mubr.msk.bf16.mxu0 %vm312_vm1, %v966_v30 }
  0xa7   :  { %v965_v39 = vcombine.low %v943_v60, %v957_v32  ;;  %v702_v9 = vcombine.low %v360_v45, %v2755_v56  ;;  %v703_v40 = vcombine.high %v360_v45, %v2755_v56  ;;  %v1002_v35 = vcombine.high %v2827_v38, %v2832_v44  ;;  %v286_v19 = vpop.permute.xlu1 %285 }
  0xa8   :  { %v691_v41 = vrot.slane %v669_v51, %v2720_v23  ;;  %v698_v13 = vrot.slane %v670_v36, %v2720_v23  ;;  %v699_v48 = vcombine.high %v677_v34, %v677_v34  ;;  %v700_v43 = vcombine.high %v684_v37, %v684_v37 }
  0xa9   :  { %v1100_v1 = vcombine.low %v651_v58, %v677_v34  ;;  %v710_v47 = vrot.slane %v702_v9, %v2720_v23  ;;  %v717_v49 = vrot.slane %v703_v40, %v2720_v23  ;;  %v1016_v52 = vrot.slane %v1000_v28, %v2720_v23 }
  0xaa   :  { %v701_v53 = vcombine.high %v691_v41, %v691_v41  ;;  %v1101_v42 = vcombine.low %v691_v41, %v699_v48  ;;  %v1165_v59 = vcombine.low %v698_v13, %v700_v43  ;;  %v1030_v56 = vrot.slane %v1002_v35, %v2720_v23 }
  0xab   :  { %v2899_v62 = vrot.slane %v1100_v1, %v2720_v23  ;;  %v718_v11 = vcombine.high %v710_v47, %v710_v47  ;;  %v719_v2 = vcombine.high %v717_v49, %v717_v49  ;;  %v726_v4 = vrot.slane %v710_v47, %v2720_v23 }
  0xac   :  { %v1102_v58 = vcombine.low %v701_v53, %v684_v37  ;;  %v1123_v46 = vrot.slane %v1101_v42, %v2720_v23  ;;  %v2904_v14 = vrot.slane %v1165_v59, %v2720_v23  ;;  %1496 = vmatmul.mubr.bf16.gmra.mrb[4].mxu0 %v965_v39  ;;  %v733_v16 = vrot.slane %v717_v49, %v2720_v23 }
  0xad   :  { %v740_v24 = vrot.slane %v718_v11, %v2720_v23  ;;  %v747_v25 = vrot.slane %v719_v2, %v2720_v23  ;;  %v1032_v57 = vcombine.low %v1016_v52, %v1030_v56  ;;  %v999_v61 = vcombine.low %v2811_v10, %v2814_v12 }
  0xae   :  { %v1130_v21 = vrot.slane %v1102_v58, %v2720_v23  ;;  %v749_v20 = vcombine.high %v733_v16, %v733_v16  ;;  %v1001_v22 = vcombine.low %v2827_v38, %v2832_v44  ;;  %v345_v7 = vsel %vm329_vm3, %v328_v5, %v181_v6 }
  0xaf   :  { %v1166_v18 = vcombine.low %v726_v4, %v740_v24  ;;  %v2356_v27 = vcombine.high %v726_v4, %v740_v24  ;;  %v1168_v0 = vcombine.low %v733_v16, %v747_v25  ;;  %2369 = vmatprep.mubr.msk.bf16.mxu0 %vm312_vm1, %v1032_v57  ;;  %v1009_v28 = vrot.slane %v999_v61, %v2720_v23 }
  0xb0   :  { %v1023_v29 = vrot.slane %v1001_v22, %v2720_v23  ;;  %v362_v10 = vsel %vm346_vm4, %v345_v7, %v286_v19  ;;  %v1066_v12 = vcombine.high %v2839_v50, %v2835_v33  ;;  %v1068_v55 = vcombine.high %v2857_v54, %v2860_v8 }
  0xb1   :  { %v1182_v38 = vrot.slane %v1166_v18, %v2720_v23  ;;  %v1189_v44 = vrot.slane %v2356_v27, %v2720_v23  ;;  %v1196_v30 = vrot.slane %v1168_v0, %v2720_v23  ;;  %v751_v31 = vcombine.low %v362_v10, %v2761_v63 }
  0xb2   :  { %v1031_v26 = vcombine.low %v1009_v28, %v1023_v29  ;;  %v752_v60 = vcombine.high %v362_v10, %v2761_v63  ;;  %v1082_v32 = vrot.slane %v1066_v12, %v2720_v23  ;;  %v1096_v45 = vrot.slane %v1068_v55, %v2720_v23 }
  0xb3   :  { %v759_v5 = vrot.slane %v751_v31, %v2720_v23  ;;  %v1065_v51 = vcombine.low %v2839_v50, %v2835_v33  ;;  %v1067_v36 = vcombine.low %v2857_v54, %v2860_v8  ;;  %v1132_v34 = vcombine.high %v2863_v17, %v2899_v62 }
  0xb4   :  { %1504 = vmatmul.mubr.bf16.gmra.mrb[8].mxu0 %v1031_v26  ;;  %v766_v37 = vrot.slane %v752_v60, %v2720_v23  ;;  %v1098_v39 = vcombine.low %v1082_v32, %v1096_v45  ;;  %v1134_v63 = vcombine.high %v1123_v46, %v1130_v21  ;;  %v1131_v9 = vcombine.low %v2863_v17, %v2899_v62  ;;  %v2452_v26 = vld [vmem:[%s3155_s3 + $0x10] sm:$0xff]   ;;  %v2453_v60 = vld [vmem:[%s3155_s3 + $0x18] sm:$0xff]   ;;  %v2454_v32 = vld [vmem:[%s3155_s3 + $0x20] sm:$0xff]  }
  0xb5   :  { %v767_v40 = vcombine.high %v759_v5, %v759_v5  ;;  %v775_v35 = vrot.slane %v759_v5, %v2720_v23  ;;  %v1075_v41 = vrot.slane %v1065_v51, %v2720_v23  ;;  %v1089_v33 = vrot.slane %v1067_v36, %v2720_v23  ;;  %v2455_v5 = vld [vmem:[%s3155_s3 + $0x28] sm:$0xff]   ;;  %v2456_v51 = vld [vmem:[%s3155_s3 + $0x30] sm:$0xff]  }
  0xb6   :  { %v768_v50 = vcombine.high %v766_v37, %v766_v37  ;;  %v782_v54 = vrot.slane %v766_v37, %v2720_v23  ;;  %2370 = vmatprep.mubr.msk.bf16.mxu0 %vm312_vm1, %v1098_v39  ;;  %v1148_v8 = vrot.slane %v1132_v34, %v2720_v23  ;;  %v1162_v13 = vrot.slane %v1134_v63, %v2720_v23 }
  0xb7   :  { %v789_v48 = vrot.slane %v767_v40, %v2720_v23  ;;  %v797_v43 = vcombine.high %v775_v35, %v775_v35  ;;  %v1231_v17 = vcombine.low %v749_v20, %v775_v35  ;;  %v1097_v1 = vcombine.low %v1075_v41, %v1089_v33 }
  0xb8   :  { %v796_v47 = vrot.slane %v768_v50, %v2720_v23  ;;  %v798_v49 = vcombine.high %v782_v54, %v782_v54  ;;  %v1164_v52 = vcombine.low %v1148_v8, %v1162_v13  ;;  %v1133_v53 = vcombine.low %v1123_v46, %v1130_v21 }
  0xb9   :  { %v799_v42 = vcombine.high %v789_v48, %v789_v48  ;;  %v1232_v59 = vcombine.low %v789_v48, %v797_v43  ;;  %v1241_v56 = vrot.slane %v1231_v17, %v2720_v23  ;;  %v1141_v62 = vrot.slane %v1131_v9, %v2720_v23 }
  0xba   :  { %v1234_v11 = vcombine.low %v796_v47, %v798_v49  ;;  %v1155_v2 = vrot.slane %v1133_v53, %v2720_v23  ;;  %v1198_v4 = vcombine.high %v2904_v14, %v1182_v38  ;;  %v1200_v6 = vcombine.high %v1189_v44, %v1196_v30 }
  0xbb   :  { %v1233_v58 = vcombine.low %v799_v42, %v782_v54  ;;  %v1248_v16 = vrot.slane %v1232_v59, %v2720_v23  ;;  %v1197_v24 = vcombine.low %v2904_v14, %v1182_v38  ;;  %v1199_v25 = vcombine.low %v1189_v44, %v1196_v30  ;;  %v2450_v30 = vld [vmem:[%s3155_s3] sm:$0xff]  }
  0xbc   :  { %v1262_v46 = vrot.slane %v1234_v11, %v2720_v23  ;;  %1512 = vmatmul.mubr.bf16.gmra.mrb[12].mxu0 %v1097_v1  ;;  %v1163_v57 = vcombine.low %v1141_v62, %v1155_v2  ;;  %v1214_v61 = vrot.slane %v1198_v4, %v2720_v23  ;;  %v1228_v19 = vrot.slane %v1200_v6, %v2720_v23 }
  0xbd   :  { %v1255_v21 = vrot.slane %v1233_v58, %v2720_v23  ;;  %2371 = vmatprep.mubr.msk.bf16.mxu0 %vm312_vm1, %v1164_v52  ;;  %v1207_v20 = vrot.slane %v1197_v24, %v2720_v23  ;;  %v1221_v22 = vrot.slane %v1199_v25, %v2720_v23  ;;  %v1264_v7 = vcombine.high %v1241_v56, %v1248_v16 }
  0xbe   :  { %v1230_v18 = vcombine.low %v1214_v61, %v1228_v19  ;;  %v1263_v14 = vcombine.low %v1241_v56, %v1248_v16  ;;  %v2487_v31 = vmov 0.0   ;;  %v387_v45 = vand.u32 127, %v383_v3  ;;  %v2457_v3 = vld [vmem:[%s3155_s3 + $0x38] sm:$0xff]  }
  0xbf   :  { %v1229_v27 = vcombine.low %v1207_v20, %v1221_v22  ;;  %v1266_v0 = vcombine.high %v1255_v21, %v1262_v46  ;;  %v1265_v28 = vcombine.low %v1255_v21, %v1262_v46  ;;  %v1280_v10 = vrot.slane %v1264_v7, %v2720_v23  ;;  %2393 = vmatprep.subr.bf16.mxu1 %v2487_v31 }
  0xc0   :  { %v1273_v29 = vrot.slane %v1263_v14, %v2720_v23  ;;  %2394 = vmatpush3.bf16.msra.mxu1 %v2450_v30  ;;  %2409 = vmatprep.mubr.msk.bf16.mxu1 %vm2488_vm5, %v2487_v31  ;;  %vm388_vm6 = vcmp.ge.s32.totalorder %v387_v45, 8  ;;  %vm389_vm7 = vcmp.lt.s32.totalorder %v387_v45, 16  ;;  %vm392_vm9 = vcmp.ge.s32.totalorder %v387_v45, 16 }
  0xc1   :  { %v1294_v12 = vrot.slane %v1266_v0, %v2720_v23  ;;  %v1287_v55 = vrot.slane %v1265_v28, %v2720_v23  ;;  %2395 = vmatprep.subr.bf16.mxu1 %v2487_v31  ;;  %v2451_v23 = vld [vmem:[%s3155_s3 + $0x8] sm:$0xff]   ;;  %vm390_vm8 = vmand %vm388_vm6, %vm389_vm7  ;;  %vm393_vm10 = vcmp.lt.s32.totalorder %v387_v45, 24  ;;  %v2489_v36 = vmov 13  }
  0xc2   :  { %v391_v34 = vsel %vm390_vm8, 12, %v2489_v36  ;;  %vm394_vm11 = vmand %vm392_vm9, %vm393_vm10  ;;  %v2490_v39 = vmov 1983009808   ;;  %v385_v40 = vadd.s32 8, %v2710_v15  ;;  %v2491_v35 = vmov -inf  }
  0xc3   :  { %v1296_v38 = vcombine.low %v1280_v10, %v1294_v12  ;;  %v1295_v44 = vcombine.low %v1273_v29, %v1287_v55  ;;  %v395_v37 = vsel %vm394_vm11, 11, %v391_v34  ;;  %v804_v63 = vunpack.c.l.s4 %v2490_v39 }
  0xc4   :  { %1520 = vmatmul.mubr.bf16.gmra.mrb[16].mxu0 %v1163_v57  ;;  %2396 = vmatpush3.bf16.msra.mxu1 %v2451_v23  ;;  %vm396_vm12 = vcmp.le.s32.totalorder %v2710_v15, %v395_v37  ;;  %vm397_vm13 = vcmp.le.s32.totalorder %v385_v40, %v395_v37  ;;  %vm2227_vm3 = vcmask 1046534   ;;  %vm2230_vm4 = vcmask 1047559  }
  0xc5   :  { %2372 = vmatprep.mubr.msk.bf16.mxu0 %vm312_vm1, %v1230_v18  ;;  %2397 = vmatprep.subr.bf16.mxu1 %v2487_v31  ;;  %v805_v9 = vunpack.c.0.s8 %v804_v63  ;;  %v398_v41 = vsel %vm396_vm12, 0.0, %v2491_v35  ;;  %v399_v54 = vsel %vm397_vm13, 0.0, %v2491_v35 }
  0xc6   :  { %v802_v33 = vcombine.high %v398_v41, %v398_v41  ;;  %v819_v48 = vcombine.high %v399_v54, %v399_v54 }
  0xc7   :  { %v2996_v50 = vsub.s32 %v805_v9, %v2710_v15 }
  0xc8   :  { %2398 = vmatpush3.bf16.msra.mxu1 %v2452_v26 }
  0xc9   :  { %2399 = vmatprep.subr.bf16.mxu1 %v2487_v31  ;;  %v809_v8 = vrot.slane %v398_v41, %v2996_v50  ;;  %v816_v13 = vrot.slane %v802_v33, %v2996_v50  ;;  %v826_v43 = vrot.slane %v399_v54, %v2996_v50  ;;  %v833_v47 = vrot.slane %v819_v48, %v2996_v50 }
  0xcb   :  { %v817_v17 = vcombine.high %v809_v8, %v809_v8  ;;  %v818_v1 = vcombine.high %v816_v13, %v816_v13  ;;  %v834_v49 = vcombine.high %v826_v43, %v826_v43  ;;  %v1382_v59 = vcombine.low %v833_v47, %v809_v8 }
  0xcc   :  { %1528 = vmatmul.mubr.bf16.gmra.mrb[20].mxu0 %v1229_v27  ;;  %2400 = vmatpush3.bf16.msra.mxu1 %v2453_v60 }
  0xcd   :  { %2373 = vmatprep.mubr.msk.bf16.mxu0 %vm312_vm1, %v1296_v38  ;;  %2401 = vmatprep.subr.bf16.mxu1 %v2487_v31  ;;  %v1364_v52 = vcombine.low %v809_v8, %v817_v17  ;;  %v1365_v53 = vcombine.low %v816_v13, %v818_v1  ;;  %v1381_v42 = vcombine.low %v826_v43, %v834_v49  ;;  %vm2221_vm1 = vcmask 1044484  }
  0xce   :  { %v1396_v11 = vrot.slane %v1382_v59, %v2996_v50  ;;  %v1398_v4 = vcombine.low %v817_v17, %v816_v13  ;;  %v1399_v6 = vcombine.low %v818_v1, %v826_v43  ;;  %v1415_v58 = vcombine.low %v834_v49, %v833_v47 }
  0xcf   :  { %v1372_v15 = vrot.slane %v1364_v52, %v2996_v50  ;;  %v1379_v56 = vrot.slane %v1365_v53, %v2996_v50  ;;  %v1389_v62 = vrot.slane %v1381_v42, %v2996_v50 }
  0xd0   :  { %2402 = vmatpush3.bf16.msra.mxu1 %v2454_v32  ;;  %v1406_v61 = vrot.slane %v1398_v4, %v2996_v50  ;;  %v3013_v19 = vrot.slane %v1399_v6, %v2996_v50  ;;  %v3016_v21 = vrot.slane %v1415_v58, %v2996_v50 }
  0xd1   :  { %2403 = vmatprep.subr.bf16.mxu1 %v2487_v31  ;;  %v3006_v2 = vcombine.low %v1372_v15, %v1379_v56  ;;  %v3008_v16 = vcombine.low %v1389_v62, %v1396_v11  ;;  %v3036_v9 = vcombine.low %v1379_v56, %v1389_v62 }
  0xd2   :  { %v3023_v29 = vcombine.low %v1406_v61, %v3013_v19  ;;  %v3026_v10 = vcombine.low %v3016_v21, %v1372_v15  ;;  %v3042_v1 = vcombine.low %v1396_v11, %v1406_v61 }
  0xd4   :  { %1536 = vmatmul.mubr.bf16.gmra.mrb[24].mxu0 %v1295_v44  ;;  %2404 = vmatpush3.bf16.msra.mxu1 %v2455_v5 }
  0xd5   :  { %2405 = vmatprep.subr.bf16.mxu1 %v2487_v31 }
  0xd8   :  { %2406 = vmatpush3.bf16.msra.mxu1 %v2456_v51 }
  0xd9   :  { %2407 = vmatprep.subr.bf16.mxu1 %v2487_v31 }
  0xdc   :  { %2408 = vmatpush3.bf16.msra.mxu1 %v2457_v3 }
 0x177   :  { %v1489_v24 = vpop.f32.mrb[0].mxu0 }
 0x178   :  { %v1490_v25 = vadd.f32 %v1489_v24, %v3006_v2  ;;  %v1491_v46 = vpop.f32.mrb[1].mxu0 }
 0x179   :  { %v1492_v57 = vpop.f32.mrb[2].mxu0 }
 0x17a   :  { %v1558_v20 = vcombine.high %v1490_v25, %v1490_v25  ;;  %v1565_v22 = vrot.slane %v1490_v25, %v2996_v50  ;;  %v1493_v7 = vadd.f32 %v1492_v57, %v3008_v16  ;;  %v1494_v18 = vpop.f32.mrb[3].mxu0 }
 0x17c   :  { %v1572_v14 = vrot.slane %v1558_v20, %v2996_v50  ;;  %v1573_v27 = vcombine.high %v1565_v22, %v1565_v22  ;;  %v1575_v0 = vcombine.high %v1493_v7, %v1493_v7  ;;  %v1582_v28 = vrot.slane %v1493_v7, %v2996_v50 }
 0x17e   :  { %v1574_v12 = vcombine.high %v1572_v14, %v1572_v14  ;;  %v1796_v55 = vcombine.low %v1565_v22, %v1573_v27  ;;  %v1589_v38 = vrot.slane %v1575_v0, %v2996_v50  ;;  %v1590_v44 = vcombine.high %v1582_v28, %v1582_v28 }
 0x17f   :  { %v1497_v30 = vpop.f32.mrb[4].mxu0  ;;  %v3054_v0 = vcombine.low %v3013_v19, %v3016_v21 }
 0x180   :  { %v1797_v31 = vcombine.low %v1572_v14, %v1574_v12  ;;  %v1813_v23 = vcombine.low %v1582_v28, %v1590_v44  ;;  %v1499_v26 = vpop.f32.mrb[5].mxu0  ;;  %v1804_v60 = vrot.slane %v1796_v55, %v2996_v50  ;;  %v1498_v32 = vadd.f32 %v1497_v30, %v3023_v29 }
 0x181   :  { %v1500_v45 = vpop.f32.mrb[6].mxu0  ;;  %v1827_v36 = vrot.slane %v1589_v38, %v2996_v50  ;;  %v1591_v37 = vcombine.high %v1589_v38, %v1589_v38 }
 0x182   :  { %v1811_v5 = vrot.slane %v1797_v31, %v2996_v50  ;;  %v1820_v51 = vrot.slane %v1813_v23, %v2996_v50  ;;  %v1501_v34 = vadd.f32 %v1500_v45, %v3026_v10  ;;  %v1502_v3 = vpop.f32.mrb[7].mxu0  ;;  %v1592_v39 = vcombine.high %v1498_v32, %v1498_v32 }
 0x183   :  { %v1599_v63 = vrot.slane %v1498_v32, %v2996_v50 }
 0x184   :  { %v1812_v40 = vcombine.low %v1804_v60, %v1811_v5  ;;  %v1828_v35 = vcombine.low %v1820_v51, %v1827_v36  ;;  %v1609_v41 = vcombine.high %v1501_v34, %v1501_v34  ;;  %v1616_v33 = vrot.slane %v1501_v34, %v2996_v50 }
 0x185   :  { %v1606_v54 = vrot.slane %v1592_v39, %v2996_v50  ;;  %v1607_v8 = vcombine.high %v1599_v63, %v1599_v63  ;;  %v1829_v13 = vcombine.low %v1591_v37, %v1599_v63  ;;  %v3066_v39 = vld [vmem:[%s3154_s2] ss:$0 sm:$0xff] }
 0x186   :  { %v2077_v48 = vsel %vm287_vm2, %v1828_v35, -inf  ;;  %v1623_v43 = vrot.slane %v1609_v41, %v2996_v50  ;;  %v1624_v17 = vcombine.high %v1616_v33, %v1616_v33 }
 0x187   :  { %v2078_v47 = vmax.f32 %v1812_v40, %v2077_v48  ;;  %v1830_v49 = vcombine.low %v1607_v8, %v1606_v54  ;;  %v1608_v52 = vcombine.high %v1606_v54, %v1606_v54  ;;  %v1505_v53 = vpop.f32.mrb[8].mxu0  ;;  %v1837_v62 = vrot.slane %v1829_v13, %v2996_v50 }
 0x188   :  { %v1625_v42 = vcombine.high %v1623_v43, %v1623_v43  ;;  %v1506_v59 = vadd.f32 %v1505_v53, %v3036_v9  ;;  %v1507_v15 = vpop.f32.mrb[9].mxu0  ;;  %v1860_v24 = vrot.slane %v1624_v17, %v2996_v50 }
 0x189   :  { %v2079_v56 = vrot.slane %v2078_v47, 4  ;;  %v1844_v4 = vrot.slane %v1830_v49, %v2996_v50  ;;  %v1846_v6 = vcombine.low %v1608_v52, %v1616_v33  ;;  %v1508_v58 = vpop.f32.mrb[10].mxu0 }
 0x18a   :  { %v1626_v25 = vcombine.high %v1506_v59, %v1506_v59  ;;  %v1633_v11 = vrot.slane %v1506_v59, %v2996_v50  ;;  %v1509_v46 = vadd.f32 %v1508_v58, %v3042_v1  ;;  %v1510_v57 = vpop.f32.mrb[11].mxu0  ;;  %v1862_v7 = vcombine.low %v1623_v43, %v1625_v42 }
 0x18b   :  { %v2080_v61 = vmax.f32 %v2078_v47, %v2079_v56  ;;  %v1845_v20 = vcombine.low %v1837_v62, %v1844_v4  ;;  %v1853_v22 = vrot.slane %v1846_v6, %v2996_v50 }
 0x18c   :  { %v1640_v18 = vrot.slane %v1626_v25, %v2996_v50  ;;  %v1641_v14 = vcombine.high %v1633_v11, %v1633_v11  ;;  %v1643_v27 = vcombine.high %v1509_v46, %v1509_v46  ;;  %v1650_v55 = vrot.slane %v1509_v46, %v2996_v50 }
 0x18d   :  { %v2081_v28 = vrot.slane %v2080_v61, 2  ;;  %v1861_v12 = vcombine.low %v1853_v22, %v1860_v24  ;;  %v1870_v23 = vrot.slane %v1862_v7, %v2996_v50 }
 0x18e   :  { %v1642_v38 = vcombine.high %v1640_v18, %v1640_v18  ;;  %v1863_v44 = vcombine.low %v1633_v11, %v1641_v14  ;;  %v1657_v30 = vrot.slane %v1643_v27, %v2996_v50  ;;  %v1658_v60 = vcombine.high %v1650_v55, %v1650_v55 }
 0x18f   :  { %v2082_v31 = vmax.f32 %v2080_v61, %v2081_v28  ;;  %v2085_v26 = vsel %vm287_vm2, %v1861_v12, -inf  ;;  %v1513_v32 = vpop.f32.mrb[12].mxu0  ;;  %v1893_v34 = vrot.slane %v1650_v55, %v2996_v50 }
 0x190   :  { %v2086_v45 = vmax.f32 %v1845_v20, %v2085_v26  ;;  %v1877_v5 = vrot.slane %v1863_v44, %v2996_v50  ;;  %v1879_v19 = vcombine.low %v1640_v18, %v1642_v38  ;;  %v1514_v21 = vadd.f32 %v1513_v32, %v3054_v0  ;;  %v1515_v51 = vpop.f32.mrb[13].mxu0 }
 0x191   :  { %v2083_v36 = vrot.slane %v2082_v31, 1  ;;  %v1895_v3 = vcombine.low %v1658_v60, %v1657_v30  ;;  %v1516_v37 = vpop.f32.mrb[14].mxu0  ;;  %v1659_v8 = vcombine.high %v1657_v30, %v1657_v30 }
 0x192   :  { %v2087_v63 = vrot.slane %v2086_v45, 4  ;;  %v1878_v40 = vcombine.low %v1870_v23, %v1877_v5  ;;  %v1886_v35 = vrot.slane %v1879_v19, %v2996_v50  ;;  %v1660_v41 = vcombine.high %v1514_v21, %v1514_v21  ;;  %v1518_v33 = vpop.f32.mrb[15].mxu0 }
 0x193   :  { %v2084_v54 = vmax.f32 %v2082_v31, %v2083_v36  ;;  %v1667_v13 = vrot.slane %v1514_v21, %v2996_v50  ;;  %v1517_v48 = vadd.f32 %v1516_v37, %v3006_v2  ;;  %v1903_v47 = vrot.slane %v1895_v3, %v2996_v50 }
 0x194   :  { %v2088_v43 = vmax.f32 %v2086_v45, %v2087_v63  ;;  %v1894_v17 = vcombine.low %v1886_v35, %v1893_v34  ;;  %v1674_v49 = vrot.slane %v1660_v41, %v2996_v50 }
 0x195   :  { %v2148_v52 = vadd.f32 %v3066_v39, %v2084_v54  ;;  %v1675_v53 = vcombine.high %v1667_v13, %v1667_v13  ;;  %v1896_v42 = vcombine.low %v1659_v8, %v1667_v13  ;;  %v1677_v59 = vcombine.high %v1517_v48, %v1517_v48 }
 0x196   :  { %v2089_v15 = vrot.slane %v2088_v43, 2  ;;  %v2093_v56 = vsel %vm287_vm2, %v1894_v17, -inf  ;;  %v1676_v62 = vcombine.high %v1674_v49, %v1674_v49  ;;  %v1684_v4 = vrot.slane %v1517_v48, %v2996_v50 }
 0x197   :  { %v2156_v6 = vmax.f32 %v2148_v52, 0.0  ;;  %v2094_v58 = vmax.f32 %v1878_v40, %v2093_v56  ;;  %v1910_v2 = vrot.slane %v1896_v42, %v2996_v50  ;;  %v1912_v24 = vcombine.low %v1675_v53, %v1674_v49  ;;  %v1521_v25 = vpop.f32.mrb[16].mxu0 }
 0x198   :  { %v2090_v11 = vmax.f32 %v2088_v43, %v2089_v15  ;;  %v1926_v46 = vrot.slane %v1676_v62, %v2996_v50  ;;  %v1691_v57 = vrot.slane %v1677_v59, %v2996_v50  ;;  %v1692_v61 = vcombine.high %v1684_v4, %v1684_v4  ;;  %v1523_v20 = vpop.f32.mrb[17].mxu0 }
 0x199   :  { %v3079_v22 = vpack.c.bf16 %v2156_v6, %v2156_v6  ;;  %v2095_v7 = vrot.slane %v2094_v58, 4  ;;  %v1911_v18 = vcombine.low %v1903_v47, %v1910_v2  ;;  %v1919_v14 = vrot.slane %v1912_v24, %v2996_v50  ;;  %v1524_v27 = vpop.f32.mrb[18].mxu0 }
 0x19a   :  { %v2091_v28 = vrot.slane %v2090_v11, 1  ;;  %v1693_v12 = vcombine.high %v1691_v57, %v1691_v57  ;;  %v1928_v55 = vcombine.low %v1684_v4, %v1692_v61  ;;  %v1522_v38 = vadd.f32 %v1521_v25, %v3008_v16  ;;  %v1526_v44 = vpop.f32.mrb[19].mxu0 }
 0x19b   :  { %v2203_v30 = vunpack.c.l.b16 %v3079_v22  ;;  %v2096_v31 = vmax.f32 %v2094_v58, %v2095_v7  ;;  %v1927_v23 = vcombine.low %v1919_v14, %v1926_v46  ;;  %v1525_v26 = vadd.f32 %v1524_v27, %v3023_v29 }
 0x19c   :  { %v2092_v60 = vmax.f32 %v2090_v11, %v2091_v28  ;;  %v1929_v32 = vcombine.low %v1691_v57, %v1693_v12  ;;  %v1936_v45 = vrot.slane %v1928_v55, %v2996_v50  ;;  %v1694_v5 = vcombine.high %v1522_v38, %v1522_v38 }
 0x19d   :  { %v2097_v19 = vrot.slane %v2096_v31, 2  ;;  %v2101_v21 = vsel %vm287_vm2, %v1927_v23, -inf  ;;  %v1701_v51 = vrot.slane %v1522_v38, %v2996_v50  ;;  %v1711_v36 = vcombine.high %v1525_v26, %v1525_v26 }
 0x19e   :  { %v2149_v16 = vadd.f32 %v3066_v39, %v2092_v60  ;;  %v2102_v34 = vmax.f32 %v1911_v18, %v2101_v21  ;;  %v1943_v3 = vrot.slane %v1929_v32, %v2996_v50  ;;  %v1708_v37 = vrot.slane %v1694_v5, %v2996_v50 }
 0x19f   :  { %v2098_v63 = vmax.f32 %v2096_v31, %v2097_v19  ;;  %v1709_v29 = vcombine.high %v1701_v51, %v1701_v51  ;;  %v1718_v40 = vrot.slane %v1525_v26, %v2996_v50  ;;  %v1725_v35 = vrot.slane %v1711_v36, %v2996_v50  ;;  %v1529_v41 = vpop.f32.mrb[20].mxu0 }
 0x1a0   :  { %v2157_v33 = vmax.f32 %v2149_v16, 0.0  ;;  %v2103_v54 = vrot.slane %v2102_v34, 4  ;;  %v1944_v8 = vcombine.low %v1936_v45, %v1943_v3  ;;  %v1959_v13 = vrot.slane %v1708_v37, %v2996_v50  ;;  %v1531_v48 = vpop.f32.mrb[21].mxu0 }
 0x1a1   :  { %v2099_v43 = vrot.slane %v2098_v63, 1  ;;  %v1945_v17 = vcombine.low %v1701_v51, %v1709_v29  ;;  %v1710_v47 = vcombine.high %v1708_v37, %v1708_v37  ;;  %v1726_v49 = vcombine.high %v1718_v40, %v1718_v40  ;;  %v1532_v52 = vpop.f32.mrb[22].mxu0 }
 0x1a2   :  { %v2165_v53 = vpack.c.bf16 %v2157_v33, %v2157_v33  ;;  %v2104_v42 = vmax.f32 %v2102_v34, %v2103_v54  ;;  %v1530_v59 = vadd.f32 %v1529_v41, %v3026_v10  ;;  %v1727_v15 = vcombine.high %v1725_v35, %v1725_v35  ;;  %v1534_v56 = vpop.f32.mrb[23].mxu0 }
 0x1a3   :  { %v2100_v62 = vmax.f32 %v2098_v63, %v2099_v43  ;;  %v1952_v4 = vrot.slane %v1945_v17, %v2996_v50  ;;  %v1961_v6 = vcombine.low %v1710_v47, %v1718_v40  ;;  %v1962_v58 = vcombine.low %v1726_v49, %v1725_v35 }
 0x1a4   :  { %v2204_v2 = vunpack.c.l.b16 %v2165_v53  ;;  %v2105_v24 = vrot.slane %v2104_v42, 2  ;;  %v1728_v25 = vcombine.high %v1530_v59, %v1530_v59  ;;  %v1735_v11 = vrot.slane %v1530_v59, %v2996_v50 }
 0x1a5   :  { %v2150_v46 = vadd.f32 %v3066_v39, %v2100_v62  ;;  %v1960_v57 = vcombine.low %v1952_v4, %v1959_v13  ;;  %v1969_v61 = vrot.slane %v1961_v6, %v2996_v50  ;;  %v1976_v20 = vrot.slane %v1962_v58, %v2996_v50 }
 0x1a6   :  { %v3100_v10 = vrot.slane %v2204_v2, 7  ;;  %v2106_v7 = vmax.f32 %v2104_v42, %v2105_v24  ;;  %v1742_v18 = vrot.slane %v1728_v25, %v2996_v50  ;;  %v1743_v14 = vcombine.high %v1735_v11, %v1735_v11 }
 0x1a7   :  { %v2158_v27 = vmax.f32 %v2150_v46, 0.0  ;;  %v2109_v28 = vsel %vm287_vm2, %v1960_v57, -inf  ;;  %v1977_v12 = vcombine.low %v1969_v61, %v1976_v20  ;;  %v1978_v55 = vcombine.low %v1727_v15, %v1735_v11  ;;  %v1537_v38 = vpop.f32.mrb[24].mxu0 }
 0x1a8   :  { %v2107_v44 = vrot.slane %v2106_v7, 1  ;;  %v2110_v31 = vmax.f32 %v1944_v8, %v2109_v28  ;;  %v1744_v23 = vcombine.high %v1742_v18, %v1742_v18  ;;  %v1992_v26 = vrot.slane %v1743_v14, %v2996_v50  ;;  %v1539_v60 = vpop.f32.mrb[25].mxu0 }
 0x1a9   :  { %v2166_v32 = vpack.c.bf16 %v2158_v27, %v2158_v27  ;;  %v1985_v45 = vrot.slane %v1978_v55, %v2996_v50  ;;  %v1533_v5 = vadd.f32 %v1532_v52, %v3036_v9  ;;  %v1538_v19 = vadd.f32 %v1537_v38, %v3042_v1  ;;  %v1540_v21 = vpop.f32.mrb[26].mxu0 }
 0x1aa   :  { %v2108_v51 = vmax.f32 %v2106_v7, %v2107_v44  ;;  %v2111_v36 = vrot.slane %v2110_v31, 4  ;;  %v1994_v16 = vcombine.low %v1742_v18, %v1744_v23  ;;  %v1541_v34 = vadd.f32 %v1540_v21, %v3054_v0  ;;  %v1542_v3 = vpop.f32.mrb[27].mxu0 }
 0x1ab   :  { %v2205_v37 = vunpack.c.l.b16 %v2166_v32  ;;  %v1993_v63 = vcombine.low %v1985_v45, %v1992_v26  ;;  %v1745_v29 = vcombine.high %v1533_v5, %v1533_v5  ;;  %v1752_v40 = vrot.slane %v1533_v5, %v2996_v50 }
 0x1ac   :  { %v2151_v35 = vadd.f32 %v3066_v39, %v2108_v51  ;;  %v2112_v41 = vmax.f32 %v2110_v31, %v2111_v36  ;;  %v2002_v9 = vrot.slane %v1994_v16, %v2996_v50  ;;  %v1762_v33 = vcombine.high %v1538_v19, %v1538_v19 }
 0x1ad   :  { %v2214_v1 = vrot.slane %v2205_v37, 6  ;;  %v2117_v54 = vsel %vm287_vm2, %v1993_v63, -inf  ;;  %v1759_v8 = vrot.slane %v1745_v29, %v2996_v50  ;;  %v1760_v13 = vcombine.high %v1752_v40, %v1752_v40 }
 0x1ae   :  { %v2159_v0 = vmax.f32 %v2151_v35, 0.0  ;;  %v2113_v48 = vrot.slane %v2112_v41, 2  ;;  %v2118_v43 = vmax.f32 %v1977_v12, %v2117_v54  ;;  %v1769_v17 = vrot.slane %v1538_v19, %v2996_v50 }
 0x1af   :  { %v1761_v47 = vcombine.high %v1759_v8, %v1759_v8  ;;  %v1995_v49 = vcombine.low %v1752_v40, %v1760_v13  ;;  %v1776_v52 = vrot.slane %v1762_v33, %v2996_v50  ;;  %v1779_v53 = vcombine.high %v1541_v34, %v1541_v34 }
 0x1b0   :  { %v2114_v42 = vmax.f32 %v2112_v41, %v2113_v48  ;;  %v2119_v59 = vrot.slane %v2118_v43, 4  ;;  %v1777_v15 = vcombine.high %v1769_v17, %v1769_v17  ;;  %v2025_v56 = vrot.slane %v1769_v17, %v2996_v50 }
 0x1b1   :  { %v2009_v62 = vrot.slane %v1995_v49, %v2996_v50  ;;  %v2011_v4 = vcombine.low %v1759_v8, %v1761_v47  ;;  %v1778_v6 = vcombine.high %v1776_v52, %v1776_v52  ;;  %v1786_v58 = vrot.slane %v1541_v34, %v2996_v50 }
 0x1b2   :  { %v2115_v2 = vrot.slane %v2114_v42, 1  ;;  %v2120_v24 = vmax.f32 %v2118_v43, %v2119_v59  ;;  %v2027_v25 = vcombine.low %v1777_v15, %v1776_v52  ;;  %v1793_v11 = vrot.slane %v1779_v53, %v2996_v50 }
 0x1b3   :  { %v2010_v46 = vcombine.low %v2002_v9, %v2009_v62  ;;  %v2018_v57 = vrot.slane %v2011_v4, %v2996_v50  ;;  %v1794_v61 = vcombine.high %v1786_v58, %v1786_v58  ;;  %v2028_v20 = vcombine.low %v1778_v6, %v1786_v58 }
 0x1b4   :  { %v2116_v7 = vmax.f32 %v2114_v42, %v2115_v2  ;;  %v2121_v18 = vrot.slane %v2120_v24, 2  ;;  %v2035_v14 = vrot.slane %v2027_v25, %v2996_v50  ;;  %v1795_v27 = vcombine.high %v1793_v11, %v1793_v11 }
 0x1b5   :  { %v2026_v28 = vcombine.low %v2018_v57, %v2025_v56  ;;  %v2042_v12 = vrot.slane %v2028_v20, %v2996_v50  ;;  %v2044_v55 = vcombine.low %v1794_v61, %v1793_v11  ;;  %v2167_v38 = vpack.c.bf16 %v2159_v0, %v2159_v0  ;;  %v2375_v61 = vld [vmem:[%s3156_s4] ss:$0 sm:$0xff] }
 0x1b6   :  { %v2122_v44 = vmax.f32 %v2120_v24, %v2121_v18  ;;  %v2058_v31 = vrot.slane %v1795_v27, %v2996_v50  ;;  %v2152_v23 = vadd.f32 %v3066_v39, %v2116_v7  ;;  %v2213_v26 = vsel %vm2212_vm14, %v3100_v10, %v2203_v30 }
 0x1b7   :  { %v2125_v60 = vsel %vm287_vm2, %v2026_v28, -inf  ;;  %v2043_v32 = vcombine.low %v2035_v14, %v2042_v12  ;;  %v2051_v45 = vrot.slane %v2044_v55, %v2996_v50  ;;  %v2206_v5 = vunpack.c.l.b16 %v2167_v38 }
 0x1b8   :  { %v2123_v19 = vrot.slane %v2122_v44, 1  ;;  %v2126_v21 = vmax.f32 %v2010_v46, %v2125_v60  ;;  %v2160_v51 = vmax.f32 %v2152_v23, 0.0  ;;  %v2216_v36 = vsel %vm2215_vm15, %v2214_v1, %v2213_v26 }
 0x1b9   :  { %v2059_v16 = vcombine.low %v2051_v45, %v2058_v31  ;;  %v2217_v34 = vrot.slane %v2206_v5, 5 }
 0x1ba   :  { %v2127_v3 = vrot.slane %v2126_v21, 4  ;;  %v2124_v37 = vmax.f32 %v2122_v44, %v2123_v19  ;;  %v2168_v63 = vpack.c.bf16 %v2160_v51, %v2160_v51 }
 0x1bb   :  { %v2133_v22 = vsel %vm287_vm2, %v2059_v16, -inf  ;;  %v2219_v30 = vsel %vm2218_vm0, %v2217_v34, %v2216_v36  ;;  %vm2224_vm2 = vcmask 1045509  }
 0x1bc   :  { %v2128_v10 = vmax.f32 %v2126_v21, %v2127_v3  ;;  %v2134_v29 = vmax.f32 %v2043_v32, %v2133_v22  ;;  %v2153_v40 = vadd.f32 %v3066_v39, %v2124_v37  ;;  %v2207_v50 = vunpack.c.l.b16 %v2168_v63 }
 0x1be   :  { %v2129_v35 = vrot.slane %v2128_v10, 2  ;;  %v2135_v41 = vrot.slane %v2134_v29, 4  ;;  %v2161_v9 = vmax.f32 %v2153_v40, 0.0  ;;  %v2220_v33 = vrot.slane %v2207_v50, 4 }
 0x1c0   :  { %v2130_v1 = vmax.f32 %v2128_v10, %v2129_v35  ;;  %v2136_v54 = vmax.f32 %v2134_v29, %v2135_v41  ;;  %v2169_v8 = vpack.c.bf16 %v2161_v9, %v2161_v9  ;;  %v2222_v13 = vsel %vm2221_vm1, %v2220_v33, %v2219_v30 }
 0x1c2   :  { %v2131_v0 = vrot.slane %v2130_v1, 1  ;;  %v2137_v48 = vrot.slane %v2136_v54, 2  ;;  %v2208_v43 = vunpack.c.l.b16 %v2169_v8 }
 0x1c4   :  { %v2138_v17 = vmax.f32 %v2136_v54, %v2137_v48  ;;  %v2132_v47 = vmax.f32 %v2130_v1, %v2131_v0  ;;  %v2223_v49 = vrot.slane %v2208_v43, 3 }
 0x1c6   :  { %v2139_v52 = vrot.slane %v2138_v17, 1  ;;  %v2154_v53 = vadd.f32 %v3066_v39, %v2132_v47  ;;  %v2225_v42 = vsel %vm2224_vm2, %v2223_v49, %v2222_v13 }
 0x1c8   :  { %v2140_v59 = vmax.f32 %v2138_v17, %v2139_v52  ;;  %v2162_v15 = vmax.f32 %v2154_v53, 0.0 }
 0x1ca   :  { %v2155_v56 = vadd.f32 %v3066_v39, %v2140_v59  ;;  %v2170_v62 = vpack.c.bf16 %v2162_v15, %v2162_v15 }
 0x1cc   :  { %v2163_v4 = vmax.f32 %v2155_v56, 0.0  ;;  %v2209_v6 = vunpack.c.l.b16 %v2170_v62 }
 0x1ce   :  { %v2171_v58 = vpack.c.bf16 %v2163_v4, %v2163_v4  ;;  %v2226_v2 = vrot.slane %v2209_v6, 2 }
 0x1d0   :  { %v2210_v24 = vunpack.c.l.b16 %v2171_v58  ;;  %v2228_v25 = vsel %vm2227_vm3, %v2226_v2, %v2225_v42 }
 0x1d2   :  { %v2229_v11 = vrot.slane %v2210_v24, 1 }
 0x1d4   :  { %v2231_v46 = vsel %vm2230_vm4, %v2229_v11, %v2228_v25 }
 0x1d5   :  { %v2232_v57 = vpack.c.b16 %v2231_v46, %v2231_v46 }
 0x1d7   :  { %2410 = vmatmul.mubr.bf16.vlgmr.msra.gmra.mrb[0].mxu1 %v2232_v57 }
 0x2aa   :  { %v2316_v39 = vpop.f32.mrb[0].mxu1 }
 0x2ab   :  { %v2317_v20 = vadd.f32 %v2375_v61, %v2316_v39  ;;  %v2411_v7 = vpop.f32.mrb[1].mxu1 }
 0x2ac   :  { %v2319_v18 = vpop.f32.mrb[2].mxu1 }
 0x2ad   :  { %2322 = vst [vmem:[#allocation2] sm:$0xff] %v2317_v20  ;;  %v2412_v14 = vpop.f32.mrb[3].mxu1 }
 0x2ae   :  { %2469 = shalt.err (!%p2466_p4)
}
 0x2af   :  { %s2470_s4 = scalar_lea.hbm %s3157_s5, 128 }
 0x2b0   :  { %p2471_p5 = scmp.ne.s32.totalorder %s3157_s5, %s2470_s4  ;;  %p2474_p6 = scmp.lt.u32.totalorder %s2470_s4, %s3157_s5 }
 0x2b2   :  { %p2476_p7 = pnand %p2474_p6, %p2471_p5 }
 0x2b4   :  { %2479 = shalt.err (!%p2476_p7)
}
 0x2b5   :  { %2332 = dma.vmem_to_hbm [thread:$0]  %s2330_s17, 128, %s3157_s5, [#allocation3]  }
 0x2b6   :  { %2480 = dma.done.wait [#allocation3], 128  }
 0x2b7   :  { %2481 = vsyncadd [#allocation3], 4294967168 }
 0x2b8   :  { %2336 = vsyncpa [#allocation3], 1 }

</bundles_post_ra>
